<compile_context>
chip_gen: v7x
topology: tpu7x:2x2x1
jax: 0.10.0
libtpu: 0.0.40
codegen_flags: <defaults>
</compile_context>

<pallas_src>
import functools
import math

import jax
import jax.numpy as jnp
from jax.experimental import pallas as pl
from jax.experimental.pallas import tpu as pltpu


def _default_vmem_limit_bytes():
    cap = 64 * 1024 * 1024
    try:
        info = pltpu.get_tpu_info()
        cap = int(getattr(info, "vmem_capacity_bytes", cap)) or cap
    except Exception:
        pass
    cap = max(cap, 64 * 1024 * 1024)          # v7x physical floor
    return (cap * 3) // 4                     # 48 MiB on v7x, 96 MiB on v5e/v6e


_VMEM_LIMIT = _default_vmem_limit_bytes()


def _cp(sem):
    return pltpu.CompilerParams(dimension_semantics=sem,
                                vmem_limit_bytes=_VMEM_LIMIT)


def _tile(dim, prefs):
    """Largest preferred tile that evenly divides `dim`; else the full dim."""
    for p in prefs:
        if dim % p == 0:
            return p
    return dim  # full-extent block is always legal (may be lane-sparse if <128)


def _round_up(x, m):
    return ((x + m - 1) // m) * m


_M_PREFS = (256, 128, 64, 32, 16, 8)
_M_PREFS_SMALL = (128, 64, 32, 16, 8)   # MLP: keep the (tm, td) hidden tile small
_N_PREFS = (512, 256, 128)
_K_PREFS = (512, 256, 128)


# ----------------------------------------------------------------------------
# Generic tiled matmul + bias (bf16 inputs, K-loop with f32 accumulator).
# ----------------------------------------------------------------------------
def _matmul_bias_kernel(x_ref, w_ref, b_ref, o_ref, acc_ref):
    @pl.when(pl.program_id(2) == 0)
    def _():
        acc_ref[...] = jnp.zeros_like(acc_ref)

    acc_ref[...] += jnp.dot(x_ref[...], w_ref[...],
                            preferred_element_type=jnp.float32)

    @pl.when(pl.program_id(2) == pl.num_programs(2) - 1)
    def _():
        o_ref[...] = (acc_ref[...] + b_ref[...]).astype(o_ref.dtype)


def pallas_matmul_bias(x2d, w, b, out_dtype=jnp.bfloat16):
    """(M,K) bf16 @ (K,N) bf16 + (N,) f32 -> (M,N) out_dtype."""
    M, K = x2d.shape
    N = w.shape[1]
    tm = _tile(M, _M_PREFS)
    tn = _tile(N, _N_PREFS)
    tk = _tile(K, _K_PREFS)
    return pl.pallas_call(
        _matmul_bias_kernel,
        out_shape=jax.ShapeDtypeStruct((M, N), out_dtype),
        grid=(M // tm, N // tn, K // tk),
        in_specs=[pl.BlockSpec((tm, tk), lambda i, j, k: (i, k)),
                  pl.BlockSpec((tk, tn), lambda i, j, k: (k, j)),
                  pl.BlockSpec((1, tn), lambda i, j, k: (0, j))],
        out_specs=pl.BlockSpec((tm, tn), lambda i, j, k: (i, j)),
        scratch_shapes=[pltpu.VMEM((tm, tn), jnp.float32)],
        compiler_params=_cp(("parallel", "parallel", "arbitrary")),
    )(x2d, w, b.reshape(1, N).astype(jnp.float32))


# ----------------------------------------------------------------------------
# Fused LayerNorm + matmul + bias (used only where N is modest: QKV, cross-Q).
# ----------------------------------------------------------------------------
def _ln_matmul_bias_kernel(x_ref, g_ref, beta_ref, w_ref, b_ref, o_ref):
    x = x_ref[...].astype(jnp.float32)
    mean = jnp.mean(x, axis=-1, keepdims=True)
    var = jnp.mean((x - mean) ** 2, axis=-1, keepdims=True)
    xn = (x - mean) * jax.lax.rsqrt(var + 1e-5)
    xn = xn * g_ref[...] + beta_ref[...]
    y = jnp.dot(xn.astype(jnp.bfloat16), w_ref[...],
                preferred_element_type=jnp.float32) + b_ref[...]
    o_ref[...] = y.astype(o_ref.dtype)


def pallas_ln_matmul_bias(x2d, g, beta, w, b, out_dtype=jnp.bfloat16):
    M, K = x2d.shape
    N = w.shape[1]
    tm = _tile(M, _M_PREFS)
    tn = _tile(N, _N_PREFS)
    return pl.pallas_call(
        _ln_matmul_bias_kernel,
        out_shape=jax.ShapeDtypeStruct((M, N), out_dtype),
        grid=(M // tm, N // tn),
        in_specs=[pl.BlockSpec((tm, K), lambda i, j: (i, 0)),
                  pl.BlockSpec((1, K), lambda i, j: (0, 0)),
                  pl.BlockSpec((1, K), lambda i, j: (0, 0)),
                  pl.BlockSpec((K, tn), lambda i, j: (0, j)),
                  pl.BlockSpec((1, tn), lambda i, j: (0, j))],
        out_specs=pl.BlockSpec((tm, tn), lambda i, j: (i, j)),
        compiler_params=_cp(("parallel", "parallel")),
    )(x2d, g.reshape(1, K), beta.reshape(1, K), w,
      b.reshape(1, N).astype(jnp.float32))


# ----------------------------------------------------------------------------
# Fused output projection + residual add (x bf16, residual f32).
# ----------------------------------------------------------------------------
def _proj_residual_kernel(x_ref, w_ref, b_ref, r_ref, o_ref):
    y = jnp.dot(x_ref[...], w_ref[...],
                preferred_element_type=jnp.float32) + b_ref[...]
    o_ref[...] = (r_ref[...] + y).astype(o_ref.dtype)


def pallas_proj_residual(x2d, w, b, res2d):
    M, K = x2d.shape
    N = w.shape[1]
    tm = _tile(M, _M_PREFS)
    tn = _tile(N, _N_PREFS)
    return pl.pallas_call(
        _proj_residual_kernel,
        out_shape=jax.ShapeDtypeStruct((M, N), jnp.float32),
        grid=(M // tm, N // tn),
        in_specs=[pl.BlockSpec((tm, K), lambda i, j: (i, 0)),
                  pl.BlockSpec((K, tn), lambda i, j: (0, j)),
                  pl.BlockSpec((1, tn), lambda i, j: (0, j)),
                  pl.BlockSpec((tm, tn), lambda i, j: (i, j))],
        out_specs=pl.BlockSpec((tm, tn), lambda i, j: (i, j)),
        compiler_params=_cp(("parallel", "parallel")),
    )(x2d, w, b.reshape(1, N).astype(jnp.float32), res2d)


# ----------------------------------------------------------------------------
# Fused LayerNorm + MLP (GELU) + residual add.
# The 4C hidden dim is streamed over grid axis 1: LN is computed once (k==0)
# into a bf16 scratch, the second matmul accumulates into an f32 scratch, so
# only a (C, td) w1 block and a (td, C) w2 block are resident at a time.
# ----------------------------------------------------------------------------
def _ln_mlp_residual_kernel(x_ref, g_ref, beta_ref, w1_ref, b1_ref,
                            w2_ref, b2_ref, o_ref, xn_ref, acc_ref):
    k = pl.program_id(1)

    @pl.when(k == 0)
    def _():
        x = x_ref[...].astype(jnp.float32)
        mean = jnp.mean(x, axis=-1, keepdims=True)
        var = jnp.mean((x - mean) ** 2, axis=-1, keepdims=True)
        xn = (x - mean) * jax.lax.rsqrt(var + 1e-5)
        xn_ref[...] = (xn * g_ref[...] + beta_ref[...]).astype(jnp.bfloat16)
        acc_ref[...] = jnp.zeros_like(acc_ref)

    h = jnp.dot(xn_ref[...], w1_ref[...],
                preferred_element_type=jnp.float32) + b1_ref[...]
    # TODO(synk): PyTorch nn.GELU default is exact erf-GELU; tanh approximation used here.
    h = jax.nn.gelu(h, approximate=True)
    acc_ref[...] += jnp.dot(h.astype(jnp.bfloat16), w2_ref[...],
                            preferred_element_type=jnp.float32)

    @pl.when(k == pl.num_programs(1) - 1)
    def _():
        # Pre-norm: the MLP residual is exactly the kernel input x.
        o_ref[...] = (acc_ref[...] + b2_ref[...]
                      + x_ref[...].astype(jnp.float32)).astype(o_ref.dtype)


def pallas_ln_mlp_residual(x2d, g, beta, w1, b1, w2, b2):
    M, C = x2d.shape
    Dh = w1.shape[1]
    tm = _tile(M, _M_PREFS_SMALL)
    td = _tile(Dh, _N_PREFS)
    return pl.pallas_call(
        _ln_mlp_residual_kernel,
        out_shape=jax.ShapeDtypeStruct((M, C), jnp.float32),
        grid=(M // tm, Dh // td),
        in_specs=[pl.BlockSpec((tm, C), lambda i, k: (i, 0)),
                  pl.BlockSpec((1, C), lambda i, k: (0, 0)),
                  pl.BlockSpec((1, C), lambda i, k: (0, 0)),
                  pl.BlockSpec((C, td), lambda i, k: (0, k)),
                  pl.BlockSpec((1, td), lambda i, k: (0, k)),
                  pl.BlockSpec((td, C), lambda i, k: (k, 0)),
                  pl.BlockSpec((1, C), lambda i, k: (0, 0))],
        out_specs=pl.BlockSpec((tm, C), lambda i, k: (i, 0)),
        scratch_shapes=[pltpu.VMEM((tm, C), jnp.bfloat16),
                        pltpu.VMEM((tm, C), jnp.float32)],
        compiler_params=_cp(("parallel", "arbitrary")),
    )(x2d, g.reshape(1, C), beta.reshape(1, C),
      w1, b1.reshape(1, Dh).astype(jnp.float32),
      w2, b2.reshape(1, C).astype(jnp.float32))


# ----------------------------------------------------------------------------
# Standalone LayerNorm (tiled over rows) — encoder/decoder final LN.
# ----------------------------------------------------------------------------
def _layernorm_kernel(x_ref, g_ref, b_ref, o_ref):
    x = x_ref[...].astype(jnp.float32)
    mean = jnp.mean(x, axis=-1, keepdims=True)
    var = jnp.mean((x - mean) ** 2, axis=-1, keepdims=True)
    xn = (x - mean) * jax.lax.rsqrt(var + 1e-5)
    o_ref[...] = (xn * g_ref[...] + b_ref[...]).astype(o_ref.dtype)


def pallas_layernorm(x2d, g, b, out_dtype=jnp.bfloat16):
    M, D = x2d.shape
    tm = _tile(M, _M_PREFS)
    return pl.pallas_call(
        _layernorm_kernel,
        out_shape=jax.ShapeDtypeStruct((M, D), out_dtype),
        grid=(M // tm,),
        in_specs=[pl.BlockSpec((tm, D), lambda i: (i, 0)),
                  pl.BlockSpec((1, D), lambda i: (0, 0)),
                  pl.BlockSpec((1, D), lambda i: (0, 0))],
        out_specs=pl.BlockSpec((tm, D), lambda i: (i, 0)),
        compiler_params=_cp(("parallel",)),
    )(x2d, g.reshape(1, D), b.reshape(1, D))


# ----------------------------------------------------------------------------
# Multi-head attention: one grid step per batch element, all heads processed
# inside the kernel with lane-dense (T, C) bf16 inputs/outputs.  Causal mask
# generated in-kernel; per-head results land in a (Tq, C) VMEM scratch and
# are written with a single lane-dense store.
# ----------------------------------------------------------------------------
def _mha_kernel(q_ref, k_ref, v_ref, o_ref, o_acc, *, n_head, causal, scale):
    q = q_ref[0]                                   # (Tq, C) bf16
    k = k_ref[0]                                   # (Tk, C) bf16
    v = v_ref[0]                                   # (Tk, C) bf16
    Tq, C = q.shape
    Tk = k.shape[0]
    hd = C // n_head

    # Fold 1/sqrt(hd) into q once (Tq*C mults instead of n_head*Tq*Tk).
    qs = (q.astype(jnp.float32) * scale).astype(jnp.bfloat16)

    if causal:
        row = jax.lax.broadcasted_iota(jnp.int32, (Tq, Tk), 0)
        col = jax.lax.broadcasted_iota(jnp.int32, (Tq, Tk), 1)
        neg = jnp.where(col > row, -1e30, 0.0).astype(jnp.float32)

    contract = (((1,), (1,)), ((), ()))            # q_h @ k_h^T without an XLU transpose
    for h in range(n_head):                        # static loop over heads
        sl = slice(h * hd, (h + 1) * hd)
        s = jax.lax.dot_general(qs[:, sl], k[:, sl], contract,
                                preferred_element_type=jnp.float32)
        if causal:
            s = s + neg
        s = s - jnp.max(s, axis=-1, keepdims=True)
        p = jnp.exp(s)
        l = jnp.sum(p, axis=-1, keepdims=True)
        oh = jnp.dot(p.astype(jnp.bfloat16), v[:, sl],
                     preferred_element_type=jnp.float32)
        o_acc[:, sl] = oh * pl.reciprocal(l, approx=True)

    o_ref[0] = o_acc[...].astype(o_ref.dtype)      # single lane-dense (Tq, C) store


def pallas_attention(q, k, v, n_head, causal):
    # TODO(synk): for long sequences switch to an online-softmax (flash) loop
    # over a KV grid axis, and split the grid over heads/Tq when B < #cores (v7x).
    B, Tq, C = q.shape
    Tk = k.shape[1]
    kernel = functools.partial(_mha_kernel, n_head=n_head, causal=causal,
                               scale=1.0 / math.sqrt(C // n_head))
    return pl.pallas_call(
        kernel,
        out_shape=jax.ShapeDtypeStruct((B, Tq, C), jnp.bfloat16),
        grid=(B,),
        in_specs=[pl.BlockSpec((1, Tq, C), lambda b: (b, 0, 0)),
                  pl.BlockSpec((1, Tk, C), lambda b: (b, 0, 0)),
                  pl.BlockSpec((1, Tk, C), lambda b: (b, 0, 0))],
        out_specs=pl.BlockSpec((1, Tq, C), lambda b: (b, 0, 0)),
        scratch_shapes=[pltpu.VMEM((Tq, C), jnp.float32)],
        compiler_params=_cp(("parallel",)),
    )(q, k, v)


# ----------------------------------------------------------------------------
# Row-tiled softmax (only used for logits=False).
# ----------------------------------------------------------------------------
def _softmax_kernel(x_ref, o_ref):
    x = x_ref[...].astype(jnp.float32)
    x = x - jnp.max(x, axis=-1, keepdims=True)
    e = jnp.exp(x)
    o_ref[...] = (e / jnp.sum(e, axis=-1, keepdims=True)).astype(o_ref.dtype)


def pallas_softmax(x2d):
    M, N = x2d.shape
    tm = _tile(M, _M_PREFS)
    return pl.pallas_call(
        _softmax_kernel,
        out_shape=jax.ShapeDtypeStruct((M, N), jnp.float32),
        grid=(M // tm,),
        in_specs=[pl.BlockSpec((tm, N), lambda i: (i, 0))],
        out_specs=pl.BlockSpec((tm, N), lambda i: (i, 0)),
        compiler_params=_cp(("parallel",)),
    )(x2d)


# ----------------------------------------------------------------------------
# Model glue (embedding lookups, block wiring) in plain JAX.
# ----------------------------------------------------------------------------
def self_attention_block(x, ln_g, ln_b, p, n_head, causal):
    B, T, C = x.shape
    x2d = x.reshape(B * T, C)
    qkv = pallas_ln_matmul_bias(x2d, ln_g, ln_b, p["wqkv"], p["bqkv"],
                                out_dtype=jnp.bfloat16)            # fused LN + QKV
    q = qkv[:, :C].reshape(B, T, C)
    k = qkv[:, C:2 * C].reshape(B, T, C)
    v = qkv[:, 2 * C:].reshape(B, T, C)
    o = pallas_attention(q, k, v, n_head, causal)                  # (B, T, C) bf16
    y = pallas_proj_residual(o.reshape(B * T, C), p["wo"], p["bo"], x2d)
    return y.reshape(B, T, C)


def cross_attention_block(x, ln_g, ln_b, enc2d, T_enc, p, n_head):
    B, Tq, C = x.shape
    x2d = x.reshape(B * Tq, C)
    q = pallas_ln_matmul_bias(x2d, ln_g, ln_b, p["wq"], p["bq"],
                              out_dtype=jnp.bfloat16).reshape(B, Tq, C)
    kv = pallas_matmul_bias(enc2d, p["wkv"], p["bkv"], out_dtype=jnp.bfloat16)
    k = kv[:, :C].reshape(B, T_enc, C)
    v = kv[:, C:].reshape(B, T_enc, C)
    o = pallas_attention(q, k, v, n_head, causal=False)
    y = pallas_proj_residual(o.reshape(B * Tq, C), p["wo"], p["bo"], x2d)
    return y.reshape(B, Tq, C)


def mlp_block(x, ln_g, ln_b, p):
    B, T, C = x.shape
    x2d = x.reshape(B * T, C)
    y = pallas_ln_mlp_residual(x2d, ln_g, ln_b, p["w1"], p["b1"], p["w2"], p["b2"])
    return y.reshape(B, T, C)


def encoder_forward(params, idx, n_head):
    B, T = idx.shape
    # TODO(synk): embedding gather stays in XLA (no clean rectangular Pallas tiling).
    x = jnp.take(params["tok_emb"], idx, axis=0) + params["pos_emb"][:T][None, :, :]
    for blk in params["blocks"]:
        x = self_attention_block(x, blk["ln1_g"], blk["ln1_b"], blk["attn"],
                                 n_head, causal=False)
        x = mlp_block(x, blk["ln2_g"], blk["ln2_b"], blk["mlp"])
    B, T, C = x.shape
    # Final LN emits bf16: the encoder output only feeds cross-attn KV matmuls.
    enc2d = pallas_layernorm(x.reshape(B * T, C), params["lnf_g"], params["lnf_b"],
                             out_dtype=jnp.bfloat16)
    return enc2d, T


def decoder_forward(params, enc2d, T_enc, idx, n_head):
    B, T = idx.shape
    x = jnp.take(params["tok_emb"], idx, axis=0) + params["pos_emb"][:T][None, :, :]
    for blk in params["blocks"]:
        x = self_attention_block(x, blk["ln1_g"], blk["ln1_b"], blk["self_attn"],
                                 n_head, causal=True)
        x = cross_attention_block(x, blk["ln2_g"], blk["ln2_b"], enc2d, T_enc,
                                  blk["cross_attn"], n_head)
        x = mlp_block(x, blk["ln3_g"], blk["ln3_b"], blk["mlp"])
    return x


def transformer_forward(params, x, cfg, logits=True):
    encoder_idx, decoder_in = x[0], x[1]
    n_head = cfg["n_head"]
    enc2d, T_enc = encoder_forward(params["encoder"], encoder_idx, n_head)
    dec_out = decoder_forward(params["decoder"], enc2d, T_enc, decoder_in, n_head)
    B, T, C = dec_out.shape
    # Decoder final LN once (not per vocab tile), then the logits projection
    # against the 128-padded vocab; slice back to the true vocab size.
    xn = pallas_layernorm(dec_out.reshape(B * T, C),
                          params["decoder"]["lnf_g"], params["decoder"]["lnf_b"],
                          out_dtype=jnp.bfloat16)
    V = cfg["target_vocab_size"]
    probs = pallas_matmul_bias(xn, params["fc1_w"], params["fc1_b"],
                               out_dtype=jnp.float32)[:, :V]
    if not logits:
        probs = pallas_softmax(probs)
    return probs.reshape(B, T, V)


# ----------------------------------------------------------------------------
# Deterministic parameter initialization (weights bf16, pre-fused, vocab-padded).
# ----------------------------------------------------------------------------
def _dense(key, fan_in, fan_out):
    return 0.02 * jax.random.normal(key, (fan_in, fan_out), jnp.float32)


def _attn_params(key, C):
    ks = jax.random.split(key, 4)
    wq, wk, wv = _dense(ks[0], C, C), _dense(ks[1], C, C), _dense(ks[2], C, C)
    return {"wqkv": jnp.concatenate([wq, wk, wv], axis=1).astype(jnp.bfloat16),
            "bqkv": jnp.zeros((3 * C,), jnp.float32),
            "wo": _dense(ks[3], C, C).astype(jnp.bfloat16),
            "bo": jnp.zeros((C,), jnp.float32)}


def _cross_attn_params(key, C):
    ks = jax.random.split(key, 4)
    wk, wv = _dense(ks[1], C, C), _dense(ks[2], C, C)
    return {"wq": _dense(ks[0], C, C).astype(jnp.bfloat16),
            "bq": jnp.zeros((C,), jnp.float32),
            "wkv": jnp.concatenate([wk, wv], axis=1).astype(jnp.bfloat16),
            "bkv": jnp.zeros((2 * C,), jnp.float32),
            "wo": _dense(ks[3], C, C).astype(jnp.bfloat16),
            "bo": jnp.zeros((C,), jnp.float32)}


def _mlp_params(key, C):
    k1, k2 = jax.random.split(key)
    return {"w1": _dense(k1, C, 4 * C).astype(jnp.bfloat16),
            "b1": jnp.zeros((4 * C,), jnp.float32),
            "w2": _dense(k2, 4 * C, C).astype(jnp.bfloat16),
            "b2": jnp.zeros((C,), jnp.float32)}


def init_params(key, cfg):
    C = cfg["n_embd"]
    keys = jax.random.split(key, 8)

    def ln():
        return jnp.ones((C,), jnp.float32), jnp.zeros((C,), jnp.float32)

    enc_blocks = []
    for i in range(cfg["n_layer"]):
        ka, km = jax.random.split(jax.random.fold_in(keys[0], i))
        g1, b1 = ln(); g2, b2 = ln()
        enc_blocks.append({"ln1_g": g1, "ln1_b": b1, "attn": _attn_params(ka, C),
                           "ln2_g": g2, "ln2_b": b2, "mlp": _mlp_params(km, C)})
    gf, bf = ln()
    encoder = {"tok_emb": 0.02 * jax.random.normal(keys[1], (cfg["source_vocab_size"], C)),
               "pos_emb": 0.02 * jax.random.normal(keys[2], (cfg["block_size"], C)),
               "blocks": enc_blocks, "lnf_g": gf, "lnf_b": bf}

    dec_blocks = []
    for i in range(cfg["n_layer"]):
        ks, kc, km = jax.random.split(jax.random.fold_in(keys[3], i), 3)
        g1, b1 = ln(); g2, b2 = ln(); g3, b3 = ln()
        dec_blocks.append({"ln1_g": g1, "ln1_b": b1, "self_attn": _attn_params(ks, C),
                           "ln2_g": g2, "ln2_b": b2,
                           "cross_attn": _cross_attn_params(kc, C),
                           "ln3_g": g3, "ln3_b": b3, "mlp": _mlp_params(km, C)})
    gf2, bf2 = ln()
    decoder = {"tok_emb": 0.02 * jax.random.normal(keys[4], (cfg["target_vocab_size"], C)),
               "pos_emb": 0.02 * jax.random.normal(keys[5], (cfg["block_size"], C)),
               "blocks": dec_blocks, "lnf_g": gf2, "lnf_b": bf2}

    # Vocab projection padded to a multiple of 128 so the logits matmul tiles
    # lane-dense (no masked narrow stores, no full-vocab weight block).
    V = cfg["target_vocab_size"]
    Vp = _round_up(V, 128)
    fc1_w = jnp.pad(_dense(keys[6], C, V), ((0, 0), (0, Vp - V))).astype(jnp.bfloat16)
    fc1_b = jnp.zeros((Vp,), jnp.float32)

    return {"encoder": encoder, "decoder": decoder, "fc1_w": fc1_w, "fc1_b": fc1_b}


# ----------------------------------------------------------------------------
if __name__ == "__main__":
    cfg = {"n_embd": 32, "n_head": 4, "n_layer": 2, "block_size": 16,
           "source_vocab_size": 50, "target_vocab_size": 50}

    key = jax.random.PRNGKey(0)
    kp, k1, k2 = jax.random.split(key, 3)
    params = init_params(kp, cfg)

    B, T_enc, T_dec = 2, 8, 8
    encoder_idx = jax.random.randint(k1, (B, T_enc), 0, cfg["source_vocab_size"], jnp.int32)
    decoder_in = jax.random.randint(k2, (B, T_dec), 0, cfg["target_vocab_size"], jnp.int32)

    fwd = jax.jit(lambda p, e, d: transformer_forward(p, (e, d), cfg, logits=True))
    out = fwd(params, encoder_idx, decoder_in)
    out = jax.block_until_ready(out)
    assert out.shape == (B, T_dec, cfg["target_vocab_size"])
    assert jnp.all(jnp.isfinite(out))
    print("KERNEL_OK")
</pallas_src>

<mosaic_0001>
module attributes {stable_mosaic.version = 11 : i64} {
  func.func @_proj_residual_kernel(%arg0: i32, %arg1: i32, %arg2: memref<16x32xbf16, #tpu.memory_space<vmem>>, %arg3: memref<32x32xbf16, #tpu.memory_space<vmem>>, %arg4: memref<1x32xf32, #tpu.memory_space<vmem>>, %arg5: memref<16x32xf32, #tpu.memory_space<vmem>>, %arg6: memref<16x32xf32, #tpu.memory_space<vmem>>) attributes {dimension_semantics = [#tpu.dimension_semantics<parallel>, #tpu.dimension_semantics<parallel>], iteration_bounds = array<i64: 1, 1>, scalar_prefetch = 0 : i64, scratch_operands = 0 : i64, tpu.core_type = #tpu.core_type<tc>, window_params = [{transform_indices = @transform_0, window_bounds = array<i64: 16, 32>}, {transform_indices = @transform_1, window_bounds = array<i64: 32, 32>}, {transform_indices = @transform_2, window_bounds = array<i64: 1, 32>}, {transform_indices = @transform_3, window_bounds = array<i64: 16, 32>}, {transform_indices = @transform_4, window_bounds = array<i64: 16, 32>}]} {
    %c0 = arith.constant 0 : index
    %c0_0 = arith.constant 0 : index
    %0 = vector.load %arg2[%c0, %c0_0] : memref<16x32xbf16, #tpu.memory_space<vmem>>, vector<16x32xbf16>
    %c0_1 = arith.constant 0 : index
    %c0_2 = arith.constant 0 : index
    %1 = vector.load %arg3[%c0_1, %c0_2] : memref<32x32xbf16, #tpu.memory_space<vmem>>, vector<32x32xbf16>
    %cst = arith.constant dense<0.000000e+00> : vector<16x32xf32>
    %2 = tpu.matmul %0, %1, %cst {dimension_numbers = #tpu.dot_dimension_numbers<[1], [0], [0], [1], [0, 0, 1, 1], [], []>} : vector<16x32xbf16>, vector<32x32xbf16>, vector<16x32xf32> -> vector<16x32xf32>
    %c0_3 = arith.constant 0 : index
    %c0_4 = arith.constant 0 : index
    %3 = vector.load %arg4[%c0_3, %c0_4] : memref<1x32xf32, #tpu.memory_space<vmem>>, vector<1x32xf32>
    %4 = vector.broadcast %3 : vector<1x32xf32> to vector<16x32xf32>
    %5 = arith.addf %2, %4 : vector<16x32xf32>
    %c0_5 = arith.constant 0 : index
    %c0_6 = arith.constant 0 : index
    %6 = vector.load %arg5[%c0_5, %c0_6] : memref<16x32xf32, #tpu.memory_space<vmem>>, vector<16x32xf32>
    %7 = arith.addf %6, %5 : vector<16x32xf32>
    %c0_7 = arith.constant 0 : index
    %c0_8 = arith.constant 0 : index
    %8 = vector.load %arg6[%c0_7, %c0_8] : memref<16x32xf32, #tpu.memory_space<vmem>>, vector<16x32xf32>
    tpu.vector_store %arg6[%c0_7, %c0_8], %7 {strides = array<i32>} : memref<16x32xf32, #tpu.memory_space<vmem>>, vector<16x32xf32>,
    return
  }
  func.func @transform_0(%arg0: i32, %arg1: i32) -> (i32, i32) {
    %c0_i32 = arith.constant 0 : i32
    %c0_i32_0 = arith.constant 0 : i32
    return %arg0, %c0_i32 : i32, i32
  }
  func.func @transform_1(%arg0: i32, %arg1: i32) -> (i32, i32) {
    %c0_i32 = arith.constant 0 : i32
    %c0_i32_0 = arith.constant 0 : i32
    return %c0_i32, %arg1 : i32, i32
  }
  func.func @transform_2(%arg0: i32, %arg1: i32) -> (i32, i32) {
    %c0_i32 = arith.constant 0 : i32
    %c0_i32_0 = arith.constant 0 : i32
    return %c0_i32, %arg1 : i32, i32
  }
  func.func @transform_3(%arg0: i32, %arg1: i32) -> (i32, i32) {
    %c0_i32 = arith.constant 0 : i32
    return %arg0, %arg1 : i32, i32
  }
  func.func @transform_4(%arg0: i32, %arg1: i32) -> (i32, i32) {
    %c0_i32 = arith.constant 0 : i32
    return %arg0, %arg1 : i32, i32
  }
}

module attributes {stable_mosaic.version = 11 : i64} {
  func.func @_ln_matmul_bias_kernel(%arg0: i32, %arg1: i32, %arg2: memref<16x32xf32, #tpu.memory_space<vmem>>, %arg3: memref<1x32xf32, #tpu.memory_space<vmem>>, %arg4: memref<1x32xf32, #tpu.memory_space<vmem>>, %arg5: memref<32x96xbf16, #tpu.memory_space<vmem>>, %arg6: memref<1x96xf32, #tpu.memory_space<vmem>>, %arg7: memref<16x96xbf16, #tpu.memory_space<vmem>>) attributes {dimension_semantics = [#tpu.dimension_semantics<parallel>, #tpu.dimension_semantics<parallel>], iteration_bounds = array<i64: 1, 1>, scalar_prefetch = 0 : i64, scratch_operands = 0 : i64, tpu.core_type = #tpu.core_type<tc>, window_params = [{transform_indices = @transform_0, window_bounds = array<i64: 16, 32>}, {pipeline_mode = #tpu.pipeline_mode<synchronous>, transform_indices = @transform_1, window_bounds = array<i64: 1, 32>}, {pipeline_mode = #tpu.pipeline_mode<synchronous>, transform_indices = @transform_2, window_bounds = array<i64: 1, 32>}, {transform_indices = @transform_3, window_bounds = array<i64: 32, 96>}, {transform_indices = @transform_4, window_bounds = array<i64: 1, 96>}, {transform_indices = @transform_5, window_bounds = array<i64: 16, 96>}]} {
    %c0 = arith.constant 0 : index
    %c0_0 = arith.constant 0 : index
    %0 = vector.load %arg2[%c0, %c0_0] : memref<16x32xf32, #tpu.memory_space<vmem>>, vector<16x32xf32>
    %cst = arith.constant dense<0.000000e+00> : vector<16xf32>
    %1 = vector.multi_reduction <add>, %0, %cst [1] : vector<16x32xf32> to vector<16xf32>
    %2 = vector.shape_cast %1 : vector<16xf32> to vector<16x1xf32>
    %cst_1 = arith.constant 3.200000e+01 : f32
    %3 = vector.broadcast %cst_1 : f32 to vector<16x1xf32>
    %4 = arith.divf %2, %3 : vector<16x1xf32>
    %5 = vector.broadcast %4 : vector<16x1xf32> to vector<16x32xf32>
    %6 = arith.subf %0, %5 : vector<16x32xf32>
    %7 = arith.mulf %6, %6 : vector<16x32xf32>
    %cst_2 = arith.constant dense<0.000000e+00> : vector<16xf32>
    %8 = vector.multi_reduction <add>, %7, %cst_2 [1] : vector<16x32xf32> to vector<16xf32>
    %9 = vector.shape_cast %8 : vector<16xf32> to vector<16x1xf32>
    %cst_3 = arith.constant 3.200000e+01 : f32
    %10 = vector.broadcast %cst_3 : f32 to vector<16x1xf32>
    %11 = arith.divf %9, %10 : vector<16x1xf32>
    %12 = vector.broadcast %4 : vector<16x1xf32> to vector<16x32xf32>
    %13 = arith.subf %0, %12 : vector<16x32xf32>
    %cst_4 = arith.constant 9.99999974E-6 : f32
    %14 = vector.broadcast %cst_4 : f32 to vector<16x1xf32>
    %15 = arith.addf %11, %14 : vector<16x1xf32>
    %16 = math.rsqrt %15 : vector<16x1xf32>
    %17 = vector.broadcast %16 : vector<16x1xf32> to vector<16x32xf32>
    %18 = arith.mulf %13, %17 : vector<16x32xf32>
    %c0_5 = arith.constant 0 : index
    %c0_6 = arith.constant 0 : index
    %19 = vector.load %arg3[%c0_5, %c0_6] : memref<1x32xf32, #tpu.memory_space<vmem>>, vector<1x32xf32>
    %20 = vector.broadcast %19 : vector<1x32xf32> to vector<16x32xf32>
    %21 = arith.mulf %18, %20 : vector<16x32xf32>
    %c0_7 = arith.constant 0 : index
    %c0_8 = arith.constant 0 : index
    %22 = vector.load %arg4[%c0_7, %c0_8] : memref<1x32xf32, #tpu.memory_space<vmem>>, vector<1x32xf32>
    %23 = vector.broadcast %22 : vector<1x32xf32> to vector<16x32xf32>
    %24 = arith.addf %21, %23 : vector<16x32xf32>
    %25 = arith.truncf %24 : vector<16x32xf32> to vector<16x32xbf16>
    %c0_9 = arith.constant 0 : index
    %c0_10 = arith.constant 0 : index
    %26 = vector.load %arg5[%c0_9, %c0_10] : memref<32x96xbf16, #tpu.memory_space<vmem>>, vector<32x96xbf16>
    %cst_11 = arith.constant dense<0.000000e+00> : vector<16x96xf32>
    %27 = tpu.matmul %25, %26, %cst_11 {dimension_numbers = #tpu.dot_dimension_numbers<[1], [0], [0], [1], [0, 0, 1, 1], [], []>} : vector<16x32xbf16>, vector<32x96xbf16>, vector<16x96xf32> -> vector<16x96xf32>
    %c0_12 = arith.constant 0 : index
    %c0_13 = arith.constant 0 : index
    %28 = vector.load %arg6[%c0_12, %c0_13] : memref<1x96xf32, #tpu.memory_space<vmem>>, vector<1x96xf32>
    %29 = vector.broadcast %28 : vector<1x96xf32> to vector<16x96xf32>
    %30 = arith.addf %27, %29 : vector<16x96xf32>
    %31 = arith.truncf %30 : vector<16x96xf32> to vector<16x96xbf16>
    %c0_14 = arith.constant 0 : index
    %c0_15 = arith.constant 0 : index
    %32 = vector.load %arg7[%c0_14, %c0_15] : memref<16x96xbf16, #tpu.memory_space<vmem>>, vector<16x96xbf16>
    tpu.vector_store %arg7[%c0_14, %c0_15], %31 {strides = array<i32>} : memref<16x96xbf16, #tpu.memory_space<vmem>>, vector<16x96xbf16>,
    return
  }
  func.func @transform_0(%arg0: i32, %arg1: i32) -> (i32, i32) {
    %c0_i32 = arith.constant 0 : i32
    %c0_i32_0 = arith.constant 0 : i32
    return %arg0, %c0_i32 : i32, i32
  }
  func.func @transform_1(%arg0: i32, %arg1: i32) -> (i32, i32) {
    %c0_i32 = arith.constant 0 : i32
    %c0_i32_0 = arith.constant 0 : i32
    %c0_i32_1 = arith.constant 0 : i32
    return %c0_i32, %c0_i32_0 : i32, i32
  }
  func.func @transform_2(%arg0: i32, %arg1: i32) -> (i32, i32) {
    %c0_i32 = arith.constant 0 : i32
    %c0_i32_0 = arith.constant 0 : i32
    %c0_i32_1 = arith.constant 0 : i32
    return %c0_i32, %c0_i32_0 : i32, i32
  }
  func.func @transform_3(%arg0: i32, %arg1: i32) -> (i32, i32) {
    %c0_i32 = arith.constant 0 : i32
    %c0_i32_0 = arith.constant 0 : i32
    return %c0_i32, %arg1 : i32, i32
  }
  func.func @transform_4(%arg0: i32, %arg1: i32) -> (i32, i32) {
    %c0_i32 = arith.constant 0 : i32
    %c0_i32_0 = arith.constant 0 : i32
    return %c0_i32, %arg1 : i32, i32
  }
  func.func @transform_5(%arg0: i32, %arg1: i32) -> (i32, i32) {
    %c0_i32 = arith.constant 0 : i32
    return %arg0, %arg1 : i32, i32
  }
}

module attributes {stable_mosaic.version = 11 : i64} {
  func.func @_mha_kernel(%arg0: i32, %arg1: memref<1x8x32xbf16, #tpu.memory_space<vmem>>, %arg2: memref<1x8x32xbf16, #tpu.memory_space<vmem>>, %arg3: memref<1x8x32xbf16, #tpu.memory_space<vmem>>, %arg4: memref<1x8x32xbf16, #tpu.memory_space<vmem>>, %arg5: memref<8x32xf32, #tpu.memory_space<vmem>>) attributes {dimension_semantics = [#tpu.dimension_semantics<parallel>], iteration_bounds = array<i64: 2>, scalar_prefetch = 0 : i64, scratch_operands = 1 : i64, tpu.core_type = #tpu.core_type<tc>, window_params = [{transform_indices = @transform_0, window_bounds = array<i64: 1, 8, 32>}, {transform_indices = @transform_1, window_bounds = array<i64: 1, 8, 32>}, {transform_indices = @transform_2, window_bounds = array<i64: 1, 8, 32>}, {transform_indices = @transform_3, window_bounds = array<i64: 1, 8, 32>}]} {
    %c0 = arith.constant 0 : index
    %c0_0 = arith.constant 0 : index
    %c0_1 = arith.constant 0 : index
    %0 = vector.load %arg1[%c0, %c0_0, %c0_1] : memref<1x8x32xbf16, #tpu.memory_space<vmem>>, vector<1x8x32xbf16>
    %1 = vector.shape_cast %0 : vector<1x8x32xbf16> to vector<8x32xbf16>
    %c0_2 = arith.constant 0 : index
    %c0_3 = arith.constant 0 : index
    %c0_4 = arith.constant 0 : index
    %2 = vector.load %arg2[%c0_2, %c0_3, %c0_4] : memref<1x8x32xbf16, #tpu.memory_space<vmem>>, vector<1x8x32xbf16>
    %3 = vector.shape_cast %2 : vector<1x8x32xbf16> to vector<8x32xbf16>
    %c0_5 = arith.constant 0 : index
    %c0_6 = arith.constant 0 : index
    %c0_7 = arith.constant 0 : index
    %4 = vector.load %arg3[%c0_5, %c0_6, %c0_7] : memref<1x8x32xbf16, #tpu.memory_space<vmem>>, vector<1x8x32xbf16>
    %5 = vector.shape_cast %4 : vector<1x8x32xbf16> to vector<8x32xbf16>
    %6 = arith.extf %1 : vector<8x32xbf16> to vector<8x32xf32>
    %cst = arith.constant 0.353553385 : f32
    %7 = vector.broadcast %cst : f32 to vector<8x32xf32>
    %8 = arith.mulf %6, %7 : vector<8x32xf32>
    %9 = arith.truncf %8 : vector<8x32xf32> to vector<8x32xbf16>
    %10 = vector.extract_strided_slice %9 {offsets = [0, 0], sizes = [8, 8], strides = [1, 1]} : vector<8x32xbf16> to vector<8x8xbf16>
    %11 = vector.extract_strided_slice %3 {offsets = [0, 0], sizes = [8, 8], strides = [1, 1]} : vector<8x32xbf16> to vector<8x8xbf16>
    %cst_8 = arith.constant dense<0.000000e+00> : vector<8x8xf32>
    %12 = tpu.matmul %10, %11, %cst_8 {dimension_numbers = #tpu.dot_dimension_numbers<[1], [1], [0], [0], [0, 0, 1, 0], [], []>} : vector<8x8xbf16>, vector<8x8xbf16>, vector<8x8xf32> -> vector<8x8xf32>
    %cst_9 = arith.constant dense<0xFF800000> : vector<8xf32>
    %13 = vector.multi_reduction <maximumf>, %12, %cst_9 [1] : vector<8x8xf32> to vector<8xf32>
    %14 = vector.shape_cast %13 : vector<8xf32> to vector<8x1xf32>
    %15 = vector.broadcast %14 : vector<8x1xf32> to vector<8x8xf32>
    %16 = arith.subf %12, %15 : vector<8x8xf32>
    %17 = math.exp %16 : vector<8x8xf32>
    %cst_10 = arith.constant dense<0.000000e+00> : vector<8xf32>
    %18 = vector.multi_reduction <add>, %17, %cst_10 [1] : vector<8x8xf32> to vector<8xf32>
    %19 = vector.shape_cast %18 : vector<8xf32> to vector<8x1xf32>
    %20 = arith.truncf %17 : vector<8x8xf32> to vector<8x8xbf16>
    %21 = vector.extract_strided_slice %5 {offsets = [0, 0], sizes = [8, 8], strides = [1, 1]} : vector<8x32xbf16> to vector<8x8xbf16>
    %cst_11 = arith.constant dense<0.000000e+00> : vector<8x8xf32>
    %22 = tpu.matmul %20, %21, %cst_11 {dimension_numbers = #tpu.dot_dimension_numbers<[1], [0], [0], [1], [0, 0, 1, 1], [], []>} : vector<8x8xbf16>, vector<8x8xbf16>, vector<8x8xf32> -> vector<8x8xf32>
    %23 = tpu.reciprocal %19 {approx = true} : vector<8x1xf32> -> vector<8x1xf32>
    %24 = vector.broadcast %23 : vector<8x1xf32> to vector<8x8xf32>
    %25 = arith.mulf %22, %24 : vector<8x8xf32>
    %c0_12 = arith.constant 0 : index
    %c0_13 = arith.constant 0 : index
    %26 = vector.load %arg5[%c0_12, %c0_13] : memref<8x32xf32, #tpu.memory_space<vmem>>, vector<8x8xf32>
    tpu.vector_store %arg5[%c0_12, %c0_13], %25 {strides = array<i32>} : memref<8x32xf32, #tpu.memory_space<vmem>>, vector<8x8xf32>,
    %27 = vector.extract_strided_slice %9 {offsets = [0, 8], sizes = [8, 8], strides = [1, 1]} : vector<8x32xbf16> to vector<8x8xbf16>
    %28 = vector.extract_strided_slice %3 {offsets = [0, 8], sizes = [8, 8], strides = [1, 1]} : vector<8x32xbf16> to vector<8x8xbf16>
    %cst_14 = arith.constant dense<0.000000e+00> : vector<8x8xf32>
    %29 = tpu.matmul %27, %28, %cst_14 {dimension_numbers = #tpu.dot_dimension_numbers<[1], [1], [0], [0], [0, 0, 1, 0], [], []>} : vector<8x8xbf16>, vector<8x8xbf16>, vector<8x8xf32> -> vector<8x8xf32>
    %cst_15 = arith.constant dense<0xFF800000> : vector<8xf32>
    %30 = vector.multi_reduction <maximumf>, %29, %cst_15 [1] : vector<8x8xf32> to vector<8xf32>
    %31 = vector.shape_cast %30 : vector<8xf32> to vector<8x1xf32>
    %32 = vector.broadcast %31 : vector<8x1xf32> to vector<8x8xf32>
    %33 = arith.subf %29, %32 : vector<8x8xf32>
    %34 = math.exp %33 : vector<8x8xf32>
    %cst_16 = arith.constant dense<0.000000e+00> : vector<8xf32>
    %35 = vector.multi_reduction <add>, %34, %cst_16 [1] : vector<8x8xf32> to vector<8xf32>
    %36 = vector.shape_cast %35 : vector<8xf32> to vector<8x1xf32>
    %37 = arith.truncf %34 : vector<8x8xf32> to vector<8x8xbf16>
    %38 = vector.extract_strided_slice %5 {offsets = [0, 8], sizes = [8, 8], strides = [1, 1]} : vector<8x32xbf16> to vector<8x8xbf16>
    %cst_17 = arith.constant dense<0.000000e+00> : vector<8x8xf32>
    %39 = tpu.matmul %37, %38, %cst_17 {dimension_numbers = #tpu.dot_dimension_numbers<[1], [0], [0], [1], [0, 0, 1, 1], [], []>} : vector<8x8xbf16>, vector<8x8xbf16>, vector<8x8xf32> -> vector<8x8xf32>
    %40 = tpu.reciprocal %36 {approx = true} : vector<8x1xf32> -> vector<8x1xf32>
    %41 = vector.broadcast %40 : vector<8x1xf32> to vector<8x8xf32>
    %42 = arith.mulf %39, %41 : vector<8x8xf32>
    %c0_18 = arith.constant 0 : index
    %c8 = arith.constant 8 : index
    %43 = vector.load %arg5[%c0_18, %c8] : memref<8x32xf32, #tpu.memory_space<vmem>>, vector<8x8xf32>
    tpu.vector_store %arg5[%c0_18, %c8], %42 {strides = array<i32>} : memref<8x32xf32, #tpu.memory_space<vmem>>, vector<8x8xf32>,
    %44 = vector.extract_strided_slice %9 {offsets = [0, 16], sizes = [8, 8], strides = [1, 1]} : vector<8x32xbf16> to vector<8x8xbf16>
    %45 = vector.extract_strided_slice %3 {offsets = [0, 16], sizes = [8, 8], strides = [1, 1]} : vector<8x32xbf16> to vector<8x8xbf16>
    %cst_19 = arith.constant dense<0.000000e+00> : vector<8x8xf32>
    %46 = tpu.matmul %44, %45, %cst_19 {dimension_numbers = #tpu.dot_dimension_numbers<[1], [1], [0], [0], [0, 0, 1, 0], [], []>} : vector<8x8xbf16>, vector<8x8xbf16>, vector<8x8xf32> -> vector<8x8xf32>
    %cst_20 = arith.constant dense<0xFF800000> : vector<8xf32>
    %47 = vector.multi_reduction <maximumf>, %46, %cst_20 [1] : vector<8x8xf32> to vector<8xf32>
    %48 = vector.shape_cast %47 : vector<8xf32> to vector<8x1xf32>
    %49 = vector.broadcast %48 : vector<8x1xf32> to vector<8x8xf32>
    %50 = arith.subf %46, %49 : vector<8x8xf32>
    %51 = math.exp %50 : vector<8x8xf32>
    %cst_21 = arith.constant dense<0.000000e+00> : vector<8xf32>
    %52 = vector.multi_reduction <add>, %51, %cst_21 [1] : vector<8x8xf32> to vector<8xf32>
    %53 = vector.shape_cast %52 : vector<8xf32> to vector<8x1xf32>
    %54 = arith.truncf %51 : vector<8x8xf32> to vector<8x8xbf16>
    %55 = vector.extract_strided_slice %5 {offsets = [0, 16], sizes = [8, 8], strides = [1, 1]} : vector<8x32xbf16> to vector<8x8xbf16>
    %cst_22 = arith.constant dense<0.000000e+00> : vector<8x8xf32>
    %56 = tpu.matmul %54, %55, %cst_22 {dimension_numbers = #tpu.dot_dimension_numbers<[1], [0], [0], [1], [0, 0, 1, 1], [], []>} : vector<8x8xbf16>, vector<8x8xbf16>, vector<8x8xf32> -> vector<8x8xf32>
    %57 = tpu.reciprocal %53 {approx = true} : vector<8x1xf32> -> vector<8x1xf32>
    %58 = vector.broadcast %57 : vector<8x1xf32> to vector<8x8xf32>
    %59 = arith.mulf %56, %58 : vector<8x8xf32>
    %c0_23 = arith.constant 0 : index
    %c16 = arith.constant 16 : index
    %60 = vector.load %arg5[%c0_23, %c16] : memref<8x32xf32, #tpu.memory_space<vmem>>, vector<8x8xf32>
    tpu.vector_store %arg5[%c0_23, %c16], %59 {strides = array<i32>} : memref<8x32xf32, #tpu.memory_space<vmem>>, vector<8x8xf32>,
    %61 = vector.extract_strided_slice %9 {offsets = [0, 24], sizes = [8, 8], strides = [1, 1]} : vector<8x32xbf16> to vector<8x8xbf16>
    %62 = vector.extract_strided_slice %3 {offsets = [0, 24], sizes = [8, 8], strides = [1, 1]} : vector<8x32xbf16> to vector<8x8xbf16>
    %cst_24 = arith.constant dense<0.000000e+00> : vector<8x8xf32>
    %63 = tpu.matmul %61, %62, %cst_24 {dimension_numbers = #tpu.dot_dimension_numbers<[1], [1], [0], [0], [0, 0, 1, 0], [], []>} : vector<8x8xbf16>, vector<8x8xbf16>, vector<8x8xf32> -> vector<8x8xf32>
    %cst_25 = arith.constant dense<0xFF800000> : vector<8xf32>
    %64 = vector.multi_reduction <maximumf>, %63, %cst_25 [1] : vector<8x8xf32> to vector<8xf32>
    %65 = vector.shape_cast %64 : vector<8xf32> to vector<8x1xf32>
    %66 = vector.broadcast %65 : vector<8x1xf32> to vector<8x8xf32>
    %67 = arith.subf %63, %66 : vector<8x8xf32>
    %68 = math.exp %67 : vector<8x8xf32>
    %cst_26 = arith.constant dense<0.000000e+00> : vector<8xf32>
    %69 = vector.multi_reduction <add>, %68, %cst_26 [1] : vector<8x8xf32> to vector<8xf32>
    %70 = vector.shape_cast %69 : vector<8xf32> to vector<8x1xf32>
    %71 = arith.truncf %68 : vector<8x8xf32> to vector<8x8xbf16>
    %72 = vector.extract_strided_slice %5 {offsets = [0, 24], sizes = [8, 8], strides = [1, 1]} : vector<8x32xbf16> to vector<8x8xbf16>
    %cst_27 = arith.constant dense<0.000000e+00> : vector<8x8xf32>
    %73 = tpu.matmul %71, %72, %cst_27 {dimension_numbers = #tpu.dot_dimension_numbers<[1], [0], [0], [1], [0, 0, 1, 1], [], []>} : vector<8x8xbf16>, vector<8x8xbf16>, vector<8x8xf32> -> vector<8x8xf32>
    %74 = tpu.reciprocal %70 {approx = true} : vector<8x1xf32> -> vector<8x1xf32>
    %75 = vector.broadcast %74 : vector<8x1xf32> to vector<8x8xf32>
    %76 = arith.mulf %73, %75 : vector<8x8xf32>
    %c0_28 = arith.constant 0 : index
    %c24 = arith.constant 24 : index
    %77 = vector.load %arg5[%c0_28, %c24] : memref<8x32xf32, #tpu.memory_space<vmem>>, vector<8x8xf32>
    tpu.vector_store %arg5[%c0_28, %c24], %76 {strides = array<i32>} : memref<8x32xf32, #tpu.memory_space<vmem>>, vector<8x8xf32>,
    %c0_29 = arith.constant 0 : index
    %c0_30 = arith.constant 0 : index
    %78 = vector.load %arg5[%c0_29, %c0_30] : memref<8x32xf32, #tpu.memory_space<vmem>>, vector<8x32xf32>
    %79 = arith.truncf %78 : vector<8x32xf32> to vector<8x32xbf16>
    %c0_31 = arith.constant 0 : index
    %c0_32 = arith.constant 0 : index
    %c0_33 = arith.constant 0 : index
    %80 = vector.load %arg4[%c0_31, %c0_32, %c0_33] : memref<1x8x32xbf16, #tpu.memory_space<vmem>>, vector<1x8x32xbf16>
    %81 = vector.shape_cast %80 : vector<1x8x32xbf16> to vector<8x32xbf16>
    %82 = vector.shape_cast %79 : vector<8x32xbf16> to vector<1x8x32xbf16>
    tpu.vector_store %arg4[%c0_31, %c0_32, %c0_33], %82 {strides = array<i32>} : memref<1x8x32xbf16, #tpu.memory_space<vmem>>, vector<1x8x32xbf16>,
    return
  }
  func.func @transform_0(%arg0: i32) -> (i32, i32, i32) {
    %c0_i32 = arith.constant 0 : i32
    %c0_i32_0 = arith.constant 0 : i32
    %c0_i32_1 = arith.constant 0 : i32
    return %arg0, %c0_i32, %c0_i32_0 : i32, i32, i32
  }
  func.func @transform_1(%arg0: i32) -> (i32, i32, i32) {
    %c0_i32 = arith.constant 0 : i32
    %c0_i32_0 = arith.constant 0 : i32
    %c0_i32_1 = arith.constant 0 : i32
    return %arg0, %c0_i32, %c0_i32_0 : i32, i32, i32
  }
  func.func @transform_2(%arg0: i32) -> (i32, i32, i32) {
    %c0_i32 = arith.constant 0 : i32
    %c0_i32_0 = arith.constant 0 : i32
    %c0_i32_1 = arith.constant 0 : i32
    return %arg0, %c0_i32, %c0_i32_0 : i32, i32, i32
  }
  func.func @transform_3(%arg0: i32) -> (i32, i32, i32) {
    %c0_i32 = arith.constant 0 : i32
    %c0_i32_0 = arith.constant 0 : i32
    %c0_i32_1 = arith.constant 0 : i32
    return %arg0, %c0_i32, %c0_i32_0 : i32, i32, i32
  }
}

module attributes {stable_mosaic.version = 11 : i64} {
  func.func @_ln_mlp_residual_kernel(%arg0: i32, %arg1: i32, %arg2: memref<16x32xf32, #tpu.memory_space<vmem>>, %arg3: memref<1x32xf32, #tpu.memory_space<vmem>>, %arg4: memref<1x32xf32, #tpu.memory_space<vmem>>, %arg5: memref<32x128xbf16, #tpu.memory_space<vmem>>, %arg6: memref<1x128xf32, #tpu.memory_space<vmem>>, %arg7: memref<128x32xbf16, #tpu.memory_space<vmem>>, %arg8: memref<1x32xf32, #tpu.memory_space<vmem>>, %arg9: memref<16x32xf32, #tpu.memory_space<vmem>>, %arg10: memref<16x32xbf16, #tpu.memory_space<vmem>>, %arg11: memref<16x32xf32, #tpu.memory_space<vmem>>) attributes {dimension_semantics = [#tpu.dimension_semantics<parallel>, #tpu.dimension_semantics<arbitrary>], iteration_bounds = array<i64: 1, 1>, scalar_prefetch = 0 : i64, scratch_operands = 2 : i64, tpu.core_type = #tpu.core_type<tc>, window_params = [{transform_indices = @transform_0, window_bounds = array<i64: 16, 32>}, {pipeline_mode = #tpu.pipeline_mode<synchronous>, transform_indices = @transform_1, window_bounds = array<i64: 1, 32>}, {pipeline_mode = #tpu.pipeline_mode<synchronous>, transform_indices = @transform_2, window_bounds = array<i64: 1, 32>}, {transform_indices = @transform_3, window_bounds = array<i64: 32, 128>}, {transform_indices = @transform_4, window_bounds = array<i64: 1, 128>}, {transform_indices = @transform_5, window_bounds = array<i64: 128, 32>}, {pipeline_mode = #tpu.pipeline_mode<synchronous>, transform_indices = @transform_6, window_bounds = array<i64: 1, 32>}, {transform_indices = @transform_7, window_bounds = array<i64: 16, 32>}]} {
    %c0_i32 = arith.constant 0 : i32
    %0 = arith.cmpi eq, %arg1, %c0_i32 : i32
    %1 = arith.extui %0 : i1 to i32
    %c0_i32_0 = arith.constant 0 : i32
    %2 = arith.cmpi ne, %1, %c0_i32_0 : i32
    scf.if %2 {
      %c0_19 = arith.constant 0 : index
      %c0_20 = arith.constant 0 : index
      %31 = vector.load %arg2[%c0_19, %c0_20] : memref<16x32xf32, #tpu.memory_space<vmem>>, vector<16x32xf32>
      %cst_21 = arith.constant dense<0.000000e+00> : vector<16xf32>
      %32 = vector.multi_reduction <add>, %31, %cst_21 [1] : vector<16x32xf32> to vector<16xf32>
      %33 = vector.shape_cast %32 : vector<16xf32> to vector<16x1xf32>
      %cst_22 = arith.constant 3.200000e+01 : f32
      %34 = vector.broadcast %cst_22 : f32 to vector<16x1xf32>
      %35 = arith.divf %33, %34 : vector<16x1xf32>
      %36 = vector.broadcast %35 : vector<16x1xf32> to vector<16x32xf32>
      %37 = arith.subf %31, %36 : vector<16x32xf32>
      %38 = arith.mulf %37, %37 : vector<16x32xf32>
      %cst_23 = arith.constant dense<0.000000e+00> : vector<16xf32>
      %39 = vector.multi_reduction <add>, %38, %cst_23 [1] : vector<16x32xf32> to vector<16xf32>
      %40 = vector.shape_cast %39 : vector<16xf32> to vector<16x1xf32>
      %cst_24 = arith.constant 3.200000e+01 : f32
      %41 = vector.broadcast %cst_24 : f32 to vector<16x1xf32>
      %42 = arith.divf %40, %41 : vector<16x1xf32>
      %43 = vector.broadcast %35 : vector<16x1xf32> to vector<16x32xf32>
      %44 = arith.subf %31, %43 : vector<16x32xf32>
      %cst_25 = arith.constant 9.99999974E-6 : f32
      %45 = vector.broadcast %cst_25 : f32 to vector<16x1xf32>
      %46 = arith.addf %42, %45 : vector<16x1xf32>
      %47 = math.rsqrt %46 : vector<16x1xf32>
      %48 = vector.broadcast %47 : vector<16x1xf32> to vector<16x32xf32>
      %49 = arith.mulf %44, %48 : vector<16x32xf32>
      %c0_26 = arith.constant 0 : index
      %c0_27 = arith.constant 0 : index
      %50 = vector.load %arg3[%c0_26, %c0_27] : memref<1x32xf32, #tpu.memory_space<vmem>>, vector<1x32xf32>
      %51 = vector.broadcast %50 : vector<1x32xf32> to vector<16x32xf32>
      %52 = arith.mulf %49, %51 : vector<16x32xf32>
      %c0_28 = arith.constant 0 : index
      %c0_29 = arith.constant 0 : index
      %53 = vector.load %arg4[%c0_28, %c0_29] : memref<1x32xf32, #tpu.memory_space<vmem>>, vector<1x32xf32>
      %54 = vector.broadcast %53 : vector<1x32xf32> to vector<16x32xf32>
      %55 = arith.addf %52, %54 : vector<16x32xf32>
      %56 = arith.truncf %55 : vector<16x32xf32> to vector<16x32xbf16>
      %c0_30 = arith.constant 0 : index
      %c0_31 = arith.constant 0 : index
      %57 = vector.load %arg10[%c0_30, %c0_31] : memref<16x32xbf16, #tpu.memory_space<vmem>>, vector<16x32xbf16>
      tpu.vector_store %arg10[%c0_30, %c0_31], %56 {strides = array<i32>} : memref<16x32xbf16, #tpu.memory_space<vmem>>, vector<16x32xbf16>,
      %cst_32 = arith.constant 0.000000e+00 : f32
      %58 = vector.broadcast %cst_32 : f32 to vector<16x32xf32>
      %c0_33 = arith.constant 0 : index
      %c0_34 = arith.constant 0 : index
      %59 = vector.load %arg11[%c0_33, %c0_34] : memref<16x32xf32, #tpu.memory_space<vmem>>, vector<16x32xf32>
      tpu.vector_store %arg11[%c0_33, %c0_34], %58 {strides = array<i32>} : memref<16x32xf32, #tpu.memory_space<vmem>>, vector<16x32xf32>,
    } else {
    }
    %c0 = arith.constant 0 : index
    %c0_1 = arith.constant 0 : index
    %3 = vector.load %arg10[%c0, %c0_1] : memref<16x32xbf16, #tpu.memory_space<vmem>>, vector<16x32xbf16>
    %c0_2 = arith.constant 0 : index
    %c0_3 = arith.constant 0 : index
    %4 = vector.load %arg5[%c0_2, %c0_3] : memref<32x128xbf16, #tpu.memory_space<vmem>>, vector<32x128xbf16>
    %cst = arith.constant dense<0.000000e+00> : vector<16x128xf32>
    %5 = tpu.matmul %3, %4, %cst {dimension_numbers = #tpu.dot_dimension_numbers<[1], [0], [0], [1], [0, 0, 1, 1], [], []>} : vector<16x32xbf16>, vector<32x128xbf16>, vector<16x128xf32> -> vector<16x128xf32>
    %c0_4 = arith.constant 0 : index
    %c0_5 = arith.constant 0 : index
    %6 = vector.load %arg6[%c0_4, %c0_5] : memref<1x128xf32, #tpu.memory_space<vmem>>, vector<1x128xf32>
    %7 = vector.broadcast %6 : vector<1x128xf32> to vector<16x128xf32>
    %8 = arith.addf %5, %7 : vector<16x128xf32>
    %9 = arith.mulf %8, %8 : vector<16x128xf32>
    %10 = arith.mulf %8, %9 : vector<16x128xf32>
    %cst_6 = arith.constant 4.471500e-02 : f32
    %11 = vector.broadcast %cst_6 : f32 to vector<16x128xf32>
    %12 = arith.mulf %11, %10 : vector<16x128xf32>
    %13 = arith.addf %8, %12 : vector<16x128xf32>
    %cst_7 = arith.constant 0.797884583 : f32
    %14 = vector.broadcast %cst_7 : f32 to vector<16x128xf32>
    %15 = arith.mulf %14, %13 : vector<16x128xf32>
    %16 = math.tanh %15 : vector<16x128xf32>
    %cst_8 = arith.constant 1.000000e+00 : f32
    %17 = vector.broadcast %cst_8 : f32 to vector<16x128xf32>
    %18 = arith.addf %17, %16 : vector<16x128xf32>
    %cst_9 = arith.constant 5.000000e-01 : f32
    %19 = vector.broadcast %cst_9 : f32 to vector<16x128xf32>
    %20 = arith.mulf %19, %18 : vector<16x128xf32>
    %21 = arith.mulf %8, %20 : vector<16x128xf32>
    %c0_10 = arith.constant 0 : index
    %c0_11 = arith.constant 0 : index
    %22 = vector.load %arg11[%c0_10, %c0_11] : memref<16x32xf32, #tpu.memory_space<vmem>>, vector<16x32xf32>
    %23 = arith.truncf %21 : vector<16x128xf32> to vector<16x128xbf16>
    %c0_12 = arith.constant 0 : index
    %c0_13 = arith.constant 0 : index
    %24 = vector.load %arg7[%c0_12, %c0_13] : memref<128x32xbf16, #tpu.memory_space<vmem>>, vector<128x32xbf16>
    %cst_14 = arith.constant dense<0.000000e+00> : vector<16x32xf32>
    %25 = tpu.matmul %23, %24, %cst_14 {dimension_numbers = #tpu.dot_dimension_numbers<[1], [0], [0], [1], [0, 0, 1, 1], [], []>} : vector<16x128xbf16>, vector<128x32xbf16>, vector<16x32xf32> -> vector<16x32xf32>
    %26 = arith.addf %22, %25 : vector<16x32xf32>
    %c0_15 = arith.constant 0 : index
    %c0_16 = arith.constant 0 : index
    %27 = vector.load %arg11[%c0_15, %c0_16] : memref<16x32xf32, #tpu.memory_space<vmem>>, vector<16x32xf32>
    tpu.vector_store %arg11[%c0_15, %c0_16], %26 {strides = array<i32>} : memref<16x32xf32, #tpu.memory_space<vmem>>, vector<16x32xf32>,
    %c0_i32_17 = arith.constant 0 : i32
    %28 = arith.cmpi eq, %arg1, %c0_i32_17 : i32
    %29 = arith.extui %28 : i1 to i32
    %c0_i32_18 = arith.constant 0 : i32
    %30 = arith.cmpi ne, %29, %c0_i32_18 : i32
    scf.if %30 {
      %c0_19 = arith.constant 0 : index
      %c0_20 = arith.constant 0 : index
      %31 = vector.load %arg11[%c0_19, %c0_20] : memref<16x32xf32, #tpu.memory_space<vmem>>, vector<16x32xf32>
      %c0_21 = arith.constant 0 : index
      %c0_22 = arith.constant 0 : index
      %32 = vector.load %arg8[%c0_21, %c0_22] : memref<1x32xf32, #tpu.memory_space<vmem>>, vector<1x32xf32>
      %33 = vector.broadcast %32 : vector<1x32xf32> to vector<16x32xf32>
      %34 = arith.addf %31, %33 : vector<16x32xf32>
      %c0_23 = arith.constant 0 : index
      %c0_24 = arith.constant 0 : index
      %35 = vector.load %arg2[%c0_23, %c0_24] : memref<16x32xf32, #tpu.memory_space<vmem>>, vector<16x32xf32>
      %36 = arith.addf %34, %35 : vector<16x32xf32>
      %c0_25 = arith.constant 0 : index
      %c0_26 = arith.constant 0 : index
      %37 = vector.load %arg9[%c0_25, %c0_26] : memref<16x32xf32, #tpu.memory_space<vmem>>, vector<16x32xf32>
      tpu.vector_store %arg9[%c0_25, %c0_26], %36 {strides = array<i32>} : memref<16x32xf32, #tpu.memory_space<vmem>>, vector<16x32xf32>,
    } else {
    }
    return
  }
  func.func @transform_0(%arg0: i32, %arg1: i32) -> (i32, i32) {
    %c0_i32 = arith.constant 0 : i32
    %c0_i32_0 = arith.constant 0 : i32
    return %arg0, %c0_i32 : i32, i32
  }
  func.func @transform_1(%arg0: i32, %arg1: i32) -> (i32, i32) {
    %c0_i32 = arith.constant 0 : i32
    %c0_i32_0 = arith.constant 0 : i32
    %c0_i32_1 = arith.constant 0 : i32
    return %c0_i32, %c0_i32_0 : i32, i32
  }
  func.func @transform_2(%arg0: i32, %arg1: i32) -> (i32, i32) {
    %c0_i32 = arith.constant 0 : i32
    %c0_i32_0 = arith.constant 0 : i32
    %c0_i32_1 = arith.constant 0 : i32
    return %c0_i32, %c0_i32_0 : i32, i32
  }
  func.func @transform_3(%arg0: i32, %arg1: i32) -> (i32, i32) {
    %c0_i32 = arith.constant 0 : i32
    %c0_i32_0 = arith.constant 0 : i32
    return %c0_i32, %arg1 : i32, i32
  }
  func.func @transform_4(%arg0: i32, %arg1: i32) -> (i32, i32) {
    %c0_i32 = arith.constant 0 : i32
    %c0_i32_0 = arith.constant 0 : i32
    return %c0_i32, %arg1 : i32, i32
  }
  func.func @transform_5(%arg0: i32, %arg1: i32) -> (i32, i32) {
    %c0_i32 = arith.constant 0 : i32
    %c0_i32_0 = arith.constant 0 : i32
    return %arg1, %c0_i32 : i32, i32
  }
  func.func @transform_6(%arg0: i32, %arg1: i32) -> (i32, i32) {
    %c0_i32 = arith.constant 0 : i32
    %c0_i32_0 = arith.constant 0 : i32
    %c0_i32_1 = arith.constant 0 : i32
    return %c0_i32, %c0_i32_0 : i32, i32
  }
  func.func @transform_7(%arg0: i32, %arg1: i32) -> (i32, i32) {
    %c0_i32 = arith.constant 0 : i32
    %c0_i32_0 = arith.constant 0 : i32
    return %arg0, %c0_i32 : i32, i32
  }
}

module attributes {stable_mosaic.version = 11 : i64} {
  func.func @_matmul_bias_kernel(%arg0: i32, %arg1: i32, %arg2: i32, %arg3: memref<16x32xbf16, #tpu.memory_space<vmem>>, %arg4: memref<32x64xbf16, #tpu.memory_space<vmem>>, %arg5: memref<1x64xf32, #tpu.memory_space<vmem>>, %arg6: memref<16x64xbf16, #tpu.memory_space<vmem>>, %arg7: memref<16x64xf32, #tpu.memory_space<vmem>>) attributes {dimension_semantics = [#tpu.dimension_semantics<parallel>, #tpu.dimension_semantics<parallel>, #tpu.dimension_semantics<arbitrary>], iteration_bounds = array<i64: 1, 1, 1>, scalar_prefetch = 0 : i64, scratch_operands = 1 : i64, tpu.core_type = #tpu.core_type<tc>, window_params = [{transform_indices = @transform_0, window_bounds = array<i64: 16, 32>}, {transform_indices = @transform_1, window_bounds = array<i64: 32, 64>}, {transform_indices = @transform_2, window_bounds = array<i64: 1, 64>}, {transform_indices = @transform_3, window_bounds = array<i64: 16, 64>}]} {
    %c0_i32 = arith.constant 0 : i32
    %0 = arith.cmpi eq, %arg2, %c0_i32 : i32
    %1 = arith.extui %0 : i1 to i32
    %c0_i32_0 = arith.constant 0 : i32
    %2 = arith.cmpi ne, %1, %c0_i32_0 : i32
    scf.if %2 {
      %cst_10 = arith.constant 0.000000e+00 : f32
      %12 = vector.broadcast %cst_10 : f32 to vector<16x64xf32>
      %c0_11 = arith.constant 0 : index
      %c0_12 = arith.constant 0 : index
      %13 = vector.load %arg7[%c0_11, %c0_12] : memref<16x64xf32, #tpu.memory_space<vmem>>, vector<16x64xf32>
      tpu.vector_store %arg7[%c0_11, %c0_12], %12 {strides = array<i32>} : memref<16x64xf32, #tpu.memory_space<vmem>>, vector<16x64xf32>,
    } else {
    }
    %c0 = arith.constant 0 : index
    %c0_1 = arith.constant 0 : index
    %3 = vector.load %arg7[%c0, %c0_1] : memref<16x64xf32, #tpu.memory_space<vmem>>, vector<16x64xf32>
    %c0_2 = arith.constant 0 : index
    %c0_3 = arith.constant 0 : index
    %4 = vector.load %arg3[%c0_2, %c0_3] : memref<16x32xbf16, #tpu.memory_space<vmem>>, vector<16x32xbf16>
    %c0_4 = arith.constant 0 : index
    %c0_5 = arith.constant 0 : index
    %5 = vector.load %arg4[%c0_4, %c0_5] : memref<32x64xbf16, #tpu.memory_space<vmem>>, vector<32x64xbf16>
    %cst = arith.constant dense<0.000000e+00> : vector<16x64xf32>
    %6 = tpu.matmul %4, %5, %cst {dimension_numbers = #tpu.dot_dimension_numbers<[1], [0], [0], [1], [0, 0, 1, 1], [], []>} : vector<16x32xbf16>, vector<32x64xbf16>, vector<16x64xf32> -> vector<16x64xf32>
    %7 = arith.addf %3, %6 : vector<16x64xf32>
    %c0_6 = arith.constant 0 : index
    %c0_7 = arith.constant 0 : index
    %8 = vector.load %arg7[%c0_6, %c0_7] : memref<16x64xf32, #tpu.memory_space<vmem>>, vector<16x64xf32>
    tpu.vector_store %arg7[%c0_6, %c0_7], %7 {strides = array<i32>} : memref<16x64xf32, #tpu.memory_space<vmem>>, vector<16x64xf32>,
    %c0_i32_8 = arith.constant 0 : i32
    %9 = arith.cmpi eq, %arg2, %c0_i32_8 : i32
    %10 = arith.extui %9 : i1 to i32
    %c0_i32_9 = arith.constant 0 : i32
    %11 = arith.cmpi ne, %10, %c0_i32_9 : i32
    scf.if %11 {
      %c0_10 = arith.constant 0 : index
      %c0_11 = arith.constant 0 : index
      %12 = vector.load %arg7[%c0_10, %c0_11] : memref<16x64xf32, #tpu.memory_space<vmem>>, vector<16x64xf32>
      %c0_12 = arith.constant 0 : index
      %c0_13 = arith.constant 0 : index
      %13 = vector.load %arg5[%c0_12, %c0_13] : memref<1x64xf32, #tpu.memory_space<vmem>>, vector<1x64xf32>
      %14 = vector.broadcast %13 : vector<1x64xf32> to vector<16x64xf32>
      %15 = arith.addf %12, %14 : vector<16x64xf32>
      %16 = arith.truncf %15 : vector<16x64xf32> to vector<16x64xbf16>
      %c0_14 = arith.constant 0 : index
      %c0_15 = arith.constant 0 : index
      %17 = vector.load %arg6[%c0_14, %c0_15] : memref<16x64xbf16, #tpu.memory_space<vmem>>, vector<16x64xbf16>
      tpu.vector_store %arg6[%c0_14, %c0_15], %16 {strides = array<i32>} : memref<16x64xbf16, #tpu.memory_space<vmem>>, vector<16x64xbf16>,
    } else {
    }
    return
  }
  func.func @transform_0(%arg0: i32, %arg1: i32, %arg2: i32) -> (i32, i32) {
    %c0_i32 = arith.constant 0 : i32
    return %arg0, %arg2 : i32, i32
  }
  func.func @transform_1(%arg0: i32, %arg1: i32, %arg2: i32) -> (i32, i32) {
    %c0_i32 = arith.constant 0 : i32
    return %arg2, %arg1 : i32, i32
  }
  func.func @transform_2(%arg0: i32, %arg1: i32, %arg2: i32) -> (i32, i32) {
    %c0_i32 = arith.constant 0 : i32
    %c0_i32_0 = arith.constant 0 : i32
    return %c0_i32, %arg1 : i32, i32
  }
  func.func @transform_3(%arg0: i32, %arg1: i32, %arg2: i32) -> (i32, i32) {
    %c0_i32 = arith.constant 0 : i32
    return %arg0, %arg1 : i32, i32
  }
}

module attributes {stable_mosaic.version = 11 : i64} {
  func.func @_layernorm_kernel(%arg0: i32, %arg1: memref<16x32xf32, #tpu.memory_space<vmem>>, %arg2: memref<1x32xf32, #tpu.memory_space<vmem>>, %arg3: memref<1x32xf32, #tpu.memory_space<vmem>>, %arg4: memref<16x32xbf16, #tpu.memory_space<vmem>>) attributes {dimension_semantics = [#tpu.dimension_semantics<parallel>], iteration_bounds = array<i64: 1>, scalar_prefetch = 0 : i64, scratch_operands = 0 : i64, tpu.core_type = #tpu.core_type<tc>, window_params = [{transform_indices = @transform_0, window_bounds = array<i64: 16, 32>}, {pipeline_mode = #tpu.pipeline_mode<synchronous>, transform_indices = @transform_1, window_bounds = array<i64: 1, 32>}, {pipeline_mode = #tpu.pipeline_mode<synchronous>, transform_indices = @transform_2, window_bounds = array<i64: 1, 32>}, {transform_indices = @transform_3, window_bounds = array<i64: 16, 32>}]} {
    %c0 = arith.constant 0 : index
    %c0_0 = arith.constant 0 : index
    %0 = vector.load %arg1[%c0, %c0_0] : memref<16x32xf32, #tpu.memory_space<vmem>>, vector<16x32xf32>
    %cst = arith.constant dense<0.000000e+00> : vector<16xf32>
    %1 = vector.multi_reduction <add>, %0, %cst [1] : vector<16x32xf32> to vector<16xf32>
    %2 = vector.shape_cast %1 : vector<16xf32> to vector<16x1xf32>
    %cst_1 = arith.constant 3.200000e+01 : f32
    %3 = vector.broadcast %cst_1 : f32 to vector<16x1xf32>
    %4 = arith.divf %2, %3 : vector<16x1xf32>
    %5 = vector.broadcast %4 : vector<16x1xf32> to vector<16x32xf32>
    %6 = arith.subf %0, %5 : vector<16x32xf32>
    %7 = arith.mulf %6, %6 : vector<16x32xf32>
    %cst_2 = arith.constant dense<0.000000e+00> : vector<16xf32>
    %8 = vector.multi_reduction <add>, %7, %cst_2 [1] : vector<16x32xf32> to vector<16xf32>
    %9 = vector.shape_cast %8 : vector<16xf32> to vector<16x1xf32>
    %cst_3 = arith.constant 3.200000e+01 : f32
    %10 = vector.broadcast %cst_3 : f32 to vector<16x1xf32>
    %11 = arith.divf %9, %10 : vector<16x1xf32>
    %12 = vector.broadcast %4 : vector<16x1xf32> to vector<16x32xf32>
    %13 = arith.subf %0, %12 : vector<16x32xf32>
    %cst_4 = arith.constant 9.99999974E-6 : f32
    %14 = vector.broadcast %cst_4 : f32 to vector<16x1xf32>
    %15 = arith.addf %11, %14 : vector<16x1xf32>
    %16 = math.rsqrt %15 : vector<16x1xf32>
    %17 = vector.broadcast %16 : vector<16x1xf32> to vector<16x32xf32>
    %18 = arith.mulf %13, %17 : vector<16x32xf32>
    %c0_5 = arith.constant 0 : index
    %c0_6 = arith.constant 0 : index
    %19 = vector.load %arg2[%c0_5, %c0_6] : memref<1x32xf32, #tpu.memory_space<vmem>>, vector<1x32xf32>
    %20 = vector.broadcast %19 : vector<1x32xf32> to vector<16x32xf32>
    %21 = arith.mulf %18, %20 : vector<16x32xf32>
    %c0_7 = arith.constant 0 : index
    %c0_8 = arith.constant 0 : index
    %22 = vector.load %arg3[%c0_7, %c0_8] : memref<1x32xf32, #tpu.memory_space<vmem>>, vector<1x32xf32>
    %23 = vector.broadcast %22 : vector<1x32xf32> to vector<16x32xf32>
    %24 = arith.addf %21, %23 : vector<16x32xf32>
    %25 = arith.truncf %24 : vector<16x32xf32> to vector<16x32xbf16>
    %c0_9 = arith.constant 0 : index
    %c0_10 = arith.constant 0 : index
    %26 = vector.load %arg4[%c0_9, %c0_10] : memref<16x32xbf16, #tpu.memory_space<vmem>>, vector<16x32xbf16>
    tpu.vector_store %arg4[%c0_9, %c0_10], %25 {strides = array<i32>} : memref<16x32xbf16, #tpu.memory_space<vmem>>, vector<16x32xbf16>,
    return
  }
  func.func @transform_0(%arg0: i32) -> (i32, i32) {
    %c0_i32 = arith.constant 0 : i32
    %c0_i32_0 = arith.constant 0 : i32
    return %arg0, %c0_i32 : i32, i32
  }
  func.func @transform_1(%arg0: i32) -> (i32, i32) {
    %c0_i32 = arith.constant 0 : i32
    %c0_i32_0 = arith.constant 0 : i32
    %c0_i32_1 = arith.constant 0 : i32
    return %c0_i32, %c0_i32_0 : i32, i32
  }
  func.func @transform_2(%arg0: i32) -> (i32, i32) {
    %c0_i32 = arith.constant 0 : i32
    %c0_i32_0 = arith.constant 0 : i32
    %c0_i32_1 = arith.constant 0 : i32
    return %c0_i32, %c0_i32_0 : i32, i32
  }
  func.func @transform_3(%arg0: i32) -> (i32, i32) {
    %c0_i32 = arith.constant 0 : i32
    %c0_i32_0 = arith.constant 0 : i32
    return %arg0, %c0_i32 : i32, i32
  }
}

module attributes {stable_mosaic.version = 11 : i64} {
  func.func @_mha_kernel(%arg0: i32, %arg1: memref<1x8x32xbf16, #tpu.memory_space<vmem>>, %arg2: memref<1x8x32xbf16, #tpu.memory_space<vmem>>, %arg3: memref<1x8x32xbf16, #tpu.memory_space<vmem>>, %arg4: memref<1x8x32xbf16, #tpu.memory_space<vmem>>, %arg5: memref<8x32xf32, #tpu.memory_space<vmem>>) attributes {dimension_semantics = [#tpu.dimension_semantics<parallel>], iteration_bounds = array<i64: 2>, scalar_prefetch = 0 : i64, scratch_operands = 1 : i64, tpu.core_type = #tpu.core_type<tc>, window_params = [{transform_indices = @transform_0, window_bounds = array<i64: 1, 8, 32>}, {transform_indices = @transform_1, window_bounds = array<i64: 1, 8, 32>}, {transform_indices = @transform_2, window_bounds = array<i64: 1, 8, 32>}, {transform_indices = @transform_3, window_bounds = array<i64: 1, 8, 32>}]} {
    %c0 = arith.constant 0 : index
    %c0_0 = arith.constant 0 : index
    %c0_1 = arith.constant 0 : index
    %0 = vector.load %arg1[%c0, %c0_0, %c0_1] : memref<1x8x32xbf16, #tpu.memory_space<vmem>>, vector<1x8x32xbf16>
    %1 = vector.shape_cast %0 : vector<1x8x32xbf16> to vector<8x32xbf16>
    %c0_2 = arith.constant 0 : index
    %c0_3 = arith.constant 0 : index
    %c0_4 = arith.constant 0 : index
    %2 = vector.load %arg2[%c0_2, %c0_3, %c0_4] : memref<1x8x32xbf16, #tpu.memory_space<vmem>>, vector<1x8x32xbf16>
    %3 = vector.shape_cast %2 : vector<1x8x32xbf16> to vector<8x32xbf16>
    %c0_5 = arith.constant 0 : index
    %c0_6 = arith.constant 0 : index
    %c0_7 = arith.constant 0 : index
    %4 = vector.load %arg3[%c0_5, %c0_6, %c0_7] : memref<1x8x32xbf16, #tpu.memory_space<vmem>>, vector<1x8x32xbf16>
    %5 = vector.shape_cast %4 : vector<1x8x32xbf16> to vector<8x32xbf16>
    %6 = arith.extf %1 : vector<8x32xbf16> to vector<8x32xf32>
    %cst = arith.constant 0.353553385 : f32
    %7 = vector.broadcast %cst : f32 to vector<8x32xf32>
    %8 = arith.mulf %6, %7 : vector<8x32xf32>
    %9 = arith.truncf %8 : vector<8x32xf32> to vector<8x32xbf16>
    %10 = tpu.iota {dimensions = array<i32: 0>} : vector<8x8xi32>
    %11 = tpu.iota {dimensions = array<i32: 1>} : vector<8x8xi32>
    %12 = arith.cmpi sgt, %11, %10 : vector<8x8xi32>
    %cst_8 = arith.constant -1.000000e+30 : f32
    %cst_9 = arith.constant 0.000000e+00 : f32
    %13 = vector.broadcast %cst_8 : f32 to vector<8x8xf32>
    %14 = vector.broadcast %cst_9 : f32 to vector<8x8xf32>
    %15 = arith.select %12, %13, %14 : vector<8x8xi1>, vector<8x8xf32>
    %16 = vector.extract_strided_slice %9 {offsets = [0, 0], sizes = [8, 8], strides = [1, 1]} : vector<8x32xbf16> to vector<8x8xbf16>
    %17 = vector.extract_strided_slice %3 {offsets = [0, 0], sizes = [8, 8], strides = [1, 1]} : vector<8x32xbf16> to vector<8x8xbf16>
    %cst_10 = arith.constant dense<0.000000e+00> : vector<8x8xf32>
    %18 = tpu.matmul %16, %17, %cst_10 {dimension_numbers = #tpu.dot_dimension_numbers<[1], [1], [0], [0], [0, 0, 1, 0], [], []>} : vector<8x8xbf16>, vector<8x8xbf16>, vector<8x8xf32> -> vector<8x8xf32>
    %19 = arith.addf %18, %15 : vector<8x8xf32>
    %cst_11 = arith.constant dense<0xFF800000> : vector<8xf32>
    %20 = vector.multi_reduction <maximumf>, %19, %cst_11 [1] : vector<8x8xf32> to vector<8xf32>
    %21 = vector.shape_cast %20 : vector<8xf32> to vector<8x1xf32>
    %22 = vector.broadcast %21 : vector<8x1xf32> to vector<8x8xf32>
    %23 = arith.subf %19, %22 : vector<8x8xf32>
    %24 = math.exp %23 : vector<8x8xf32>
    %cst_12 = arith.constant dense<0.000000e+00> : vector<8xf32>
    %25 = vector.multi_reduction <add>, %24, %cst_12 [1] : vector<8x8xf32> to vector<8xf32>
    %26 = vector.shape_cast %25 : vector<8xf32> to vector<8x1xf32>
    %27 = arith.truncf %24 : vector<8x8xf32> to vector<8x8xbf16>
    %28 = vector.extract_strided_slice %5 {offsets = [0, 0], sizes = [8, 8], strides = [1, 1]} : vector<8x32xbf16> to vector<8x8xbf16>
    %cst_13 = arith.constant dense<0.000000e+00> : vector<8x8xf32>
    %29 = tpu.matmul %27, %28, %cst_13 {dimension_numbers = #tpu.dot_dimension_numbers<[1], [0], [0], [1], [0, 0, 1, 1], [], []>} : vector<8x8xbf16>, vector<8x8xbf16>, vector<8x8xf32> -> vector<8x8xf32>
    %30 = tpu.reciprocal %26 {approx = true} : vector<8x1xf32> -> vector<8x1xf32>
    %31 = vector.broadcast %30 : vector<8x1xf32> to vector<8x8xf32>
    %32 = arith.mulf %29, %31 : vector<8x8xf32>
    %c0_14 = arith.constant 0 : index
    %c0_15 = arith.constant 0 : index
    %33 = vector.load %arg5[%c0_14, %c0_15] : memref<8x32xf32, #tpu.memory_space<vmem>>, vector<8x8xf32>
    tpu.vector_store %arg5[%c0_14, %c0_15], %32 {strides = array<i32>} : memref<8x32xf32, #tpu.memory_space<vmem>>, vector<8x8xf32>,
    %34 = vector.extract_strided_slice %9 {offsets = [0, 8], sizes = [8, 8], strides = [1, 1]} : vector<8x32xbf16> to vector<8x8xbf16>
    %35 = vector.extract_strided_slice %3 {offsets = [0, 8], sizes = [8, 8], strides = [1, 1]} : vector<8x32xbf16> to vector<8x8xbf16>
    %cst_16 = arith.constant dense<0.000000e+00> : vector<8x8xf32>
    %36 = tpu.matmul %34, %35, %cst_16 {dimension_numbers = #tpu.dot_dimension_numbers<[1], [1], [0], [0], [0, 0, 1, 0], [], []>} : vector<8x8xbf16>, vector<8x8xbf16>, vector<8x8xf32> -> vector<8x8xf32>
    %37 = arith.addf %36, %15 : vector<8x8xf32>
    %cst_17 = arith.constant dense<0xFF800000> : vector<8xf32>
    %38 = vector.multi_reduction <maximumf>, %37, %cst_17 [1] : vector<8x8xf32> to vector<8xf32>
    %39 = vector.shape_cast %38 : vector<8xf32> to vector<8x1xf32>
    %40 = vector.broadcast %39 : vector<8x1xf32> to vector<8x8xf32>
    %41 = arith.subf %37, %40 : vector<8x8xf32>
    %42 = math.exp %41 : vector<8x8xf32>
    %cst_18 = arith.constant dense<0.000000e+00> : vector<8xf32>
    %43 = vector.multi_reduction <add>, %42, %cst_18 [1] : vector<8x8xf32> to vector<8xf32>
    %44 = vector.shape_cast %43 : vector<8xf32> to vector<8x1xf32>
    %45 = arith.truncf %42 : vector<8x8xf32> to vector<8x8xbf16>
    %46 = vector.extract_strided_slice %5 {offsets = [0, 8], sizes = [8, 8], strides = [1, 1]} : vector<8x32xbf16> to vector<8x8xbf16>
    %cst_19 = arith.constant dense<0.000000e+00> : vector<8x8xf32>
    %47 = tpu.matmul %45, %46, %cst_19 {dimension_numbers = #tpu.dot_dimension_numbers<[1], [0], [0], [1], [0, 0, 1, 1], [], []>} : vector<8x8xbf16>, vector<8x8xbf16>, vector<8x8xf32> -> vector<8x8xf32>
    %48 = tpu.reciprocal %44 {approx = true} : vector<8x1xf32> -> vector<8x1xf32>
    %49 = vector.broadcast %48 : vector<8x1xf32> to vector<8x8xf32>
    %50 = arith.mulf %47, %49 : vector<8x8xf32>
    %c0_20 = arith.constant 0 : index
    %c8 = arith.constant 8 : index
    %51 = vector.load %arg5[%c0_20, %c8] : memref<8x32xf32, #tpu.memory_space<vmem>>, vector<8x8xf32>
    tpu.vector_store %arg5[%c0_20, %c8], %50 {strides = array<i32>} : memref<8x32xf32, #tpu.memory_space<vmem>>, vector<8x8xf32>,
    %52 = vector.extract_strided_slice %9 {offsets = [0, 16], sizes = [8, 8], strides = [1, 1]} : vector<8x32xbf16> to vector<8x8xbf16>
    %53 = vector.extract_strided_slice %3 {offsets = [0, 16], sizes = [8, 8], strides = [1, 1]} : vector<8x32xbf16> to vector<8x8xbf16>
    %cst_21 = arith.constant dense<0.000000e+00> : vector<8x8xf32>
    %54 = tpu.matmul %52, %53, %cst_21 {dimension_numbers = #tpu.dot_dimension_numbers<[1], [1], [0], [0], [0, 0, 1, 0], [], []>} : vector<8x8xbf16>, vector<8x8xbf16>, vector<8x8xf32> -> vector<8x8xf32>
    %55 = arith.addf %54, %15 : vector<8x8xf32>
    %cst_22 = arith.constant dense<0xFF800000> : vector<8xf32>
    %56 = vector.multi_reduction <maximumf>, %55, %cst_22 [1] : vector<8x8xf32> to vector<8xf32>
    %57 = vector.shape_cast %56 : vector<8xf32> to vector<8x1xf32>
    %58 = vector.broadcast %57 : vector<8x1xf32> to vector<8x8xf32>
    %59 = arith.subf %55, %58 : vector<8x8xf32>
    %60 = math.exp %59 : vector<8x8xf32>
    %cst_23 = arith.constant dense<0.000000e+00> : vector<8xf32>
    %61 = vector.multi_reduction <add>, %60, %cst_23 [1] : vector<8x8xf32> to vector<8xf32>
    %62 = vector.shape_cast %61 : vector<8xf32> to vector<8x1xf32>
    %63 = arith.truncf %60 : vector<8x8xf32> to vector<8x8xbf16>
    %64 = vector.extract_strided_slice %5 {offsets = [0, 16], sizes = [8, 8], strides = [1, 1]} : vector<8x32xbf16> to vector<8x8xbf16>
    %cst_24 = arith.constant dense<0.000000e+00> : vector<8x8xf32>
    %65 = tpu.matmul %63, %64, %cst_24 {dimension_numbers = #tpu.dot_dimension_numbers<[1], [0], [0], [1], [0, 0, 1, 1], [], []>} : vector<8x8xbf16>, vector<8x8xbf16>, vector<8x8xf32> -> vector<8x8xf32>
    %66 = tpu.reciprocal %62 {approx = true} : vector<8x1xf32> -> vector<8x1xf32>
    %67 = vector.broadcast %66 : vector<8x1xf32> to vector<8x8xf32>
    %68 = arith.mulf %65, %67 : vector<8x8xf32>
    %c0_25 = arith.constant 0 : index
    %c16 = arith.constant 16 : index
    %69 = vector.load %arg5[%c0_25, %c16] : memref<8x32xf32, #tpu.memory_space<vmem>>, vector<8x8xf32>
    tpu.vector_store %arg5[%c0_25, %c16], %68 {strides = array<i32>} : memref<8x32xf32, #tpu.memory_space<vmem>>, vector<8x8xf32>,
    %70 = vector.extract_strided_slice %9 {offsets = [0, 24], sizes = [8, 8], strides = [1, 1]} : vector<8x32xbf16> to vector<8x8xbf16>
    %71 = vector.extract_strided_slice %3 {offsets = [0, 24], sizes = [8, 8], strides = [1, 1]} : vector<8x32xbf16> to vector<8x8xbf16>
    %cst_26 = arith.constant dense<0.000000e+00> : vector<8x8xf32>
    %72 = tpu.matmul %70, %71, %cst_26 {dimension_numbers = #tpu.dot_dimension_numbers<[1], [1], [0], [0], [0, 0, 1, 0], [], []>} : vector<8x8xbf16>, vector<8x8xbf16>, vector<8x8xf32> -> vector<8x8xf32>
    %73 = arith.addf %72, %15 : vector<8x8xf32>
    %cst_27 = arith.constant dense<0xFF800000> : vector<8xf32>
    %74 = vector.multi_reduction <maximumf>, %73, %cst_27 [1] : vector<8x8xf32> to vector<8xf32>
    %75 = vector.shape_cast %74 : vector<8xf32> to vector<8x1xf32>
    %76 = vector.broadcast %75 : vector<8x1xf32> to vector<8x8xf32>
    %77 = arith.subf %73, %76 : vector<8x8xf32>
    %78 = math.exp %77 : vector<8x8xf32>
    %cst_28 = arith.constant dense<0.000000e+00> : vector<8xf32>
    %79 = vector.multi_reduction <add>, %78, %cst_28 [1] : vector<8x8xf32> to vector<8xf32>
    %80 = vector.shape_cast %79 : vector<8xf32> to vector<8x1xf32>
    %81 = arith.truncf %78 : vector<8x8xf32> to vector<8x8xbf16>
    %82 = vector.extract_strided_slice %5 {offsets = [0, 24], sizes = [8, 8], strides = [1, 1]} : vector<8x32xbf16> to vector<8x8xbf16>
    %cst_29 = arith.constant dense<0.000000e+00> : vector<8x8xf32>
    %83 = tpu.matmul %81, %82, %cst_29 {dimension_numbers = #tpu.dot_dimension_numbers<[1], [0], [0], [1], [0, 0, 1, 1], [], []>} : vector<8x8xbf16>, vector<8x8xbf16>, vector<8x8xf32> -> vector<8x8xf32>
    %84 = tpu.reciprocal %80 {approx = true} : vector<8x1xf32> -> vector<8x1xf32>
    %85 = vector.broadcast %84 : vector<8x1xf32> to vector<8x8xf32>
    %86 = arith.mulf %83, %85 : vector<8x8xf32>
    %c0_30 = arith.constant 0 : index
    %c24 = arith.constant 24 : index
    %87 = vector.load %arg5[%c0_30, %c24] : memref<8x32xf32, #tpu.memory_space<vmem>>, vector<8x8xf32>
    tpu.vector_store %arg5[%c0_30, %c24], %86 {strides = array<i32>} : memref<8x32xf32, #tpu.memory_space<vmem>>, vector<8x8xf32>,
    %c0_31 = arith.constant 0 : index
    %c0_32 = arith.constant 0 : index
    %88 = vector.load %arg5[%c0_31, %c0_32] : memref<8x32xf32, #tpu.memory_space<vmem>>, vector<8x32xf32>
    %89 = arith.truncf %88 : vector<8x32xf32> to vector<8x32xbf16>
    %c0_33 = arith.constant 0 : index
    %c0_34 = arith.constant 0 : index
    %c0_35 = arith.constant 0 : index
    %90 = vector.load %arg4[%c0_33, %c0_34, %c0_35] : memref<1x8x32xbf16, #tpu.memory_space<vmem>>, vector<1x8x32xbf16>
    %91 = vector.shape_cast %90 : vector<1x8x32xbf16> to vector<8x32xbf16>
    %92 = vector.shape_cast %89 : vector<8x32xbf16> to vector<1x8x32xbf16>
    tpu.vector_store %arg4[%c0_33, %c0_34, %c0_35], %92 {strides = array<i32>} : memref<1x8x32xbf16, #tpu.memory_space<vmem>>, vector<1x8x32xbf16>,
    return
  }
  func.func @transform_0(%arg0: i32) -> (i32, i32, i32) {
    %c0_i32 = arith.constant 0 : i32
    %c0_i32_0 = arith.constant 0 : i32
    %c0_i32_1 = arith.constant 0 : i32
    return %arg0, %c0_i32, %c0_i32_0 : i32, i32, i32
  }
  func.func @transform_1(%arg0: i32) -> (i32, i32, i32) {
    %c0_i32 = arith.constant 0 : i32
    %c0_i32_0 = arith.constant 0 : i32
    %c0_i32_1 = arith.constant 0 : i32
    return %arg0, %c0_i32, %c0_i32_0 : i32, i32, i32
  }
  func.func @transform_2(%arg0: i32) -> (i32, i32, i32) {
    %c0_i32 = arith.constant 0 : i32
    %c0_i32_0 = arith.constant 0 : i32
    %c0_i32_1 = arith.constant 0 : i32
    return %arg0, %c0_i32, %c0_i32_0 : i32, i32, i32
  }
  func.func @transform_3(%arg0: i32) -> (i32, i32, i32) {
    %c0_i32 = arith.constant 0 : i32
    %c0_i32_0 = arith.constant 0 : i32
    %c0_i32_1 = arith.constant 0 : i32
    return %arg0, %c0_i32, %c0_i32_0 : i32, i32, i32
  }
}

module attributes {stable_mosaic.version = 11 : i64} {
  func.func @_ln_matmul_bias_kernel(%arg0: i32, %arg1: i32, %arg2: memref<16x32xf32, #tpu.memory_space<vmem>>, %arg3: memref<1x32xf32, #tpu.memory_space<vmem>>, %arg4: memref<1x32xf32, #tpu.memory_space<vmem>>, %arg5: memref<32x32xbf16, #tpu.memory_space<vmem>>, %arg6: memref<1x32xf32, #tpu.memory_space<vmem>>, %arg7: memref<16x32xbf16, #tpu.memory_space<vmem>>) attributes {dimension_semantics = [#tpu.dimension_semantics<parallel>, #tpu.dimension_semantics<parallel>], iteration_bounds = array<i64: 1, 1>, scalar_prefetch = 0 : i64, scratch_operands = 0 : i64, tpu.core_type = #tpu.core_type<tc>, window_params = [{transform_indices = @transform_0, window_bounds = array<i64: 16, 32>}, {pipeline_mode = #tpu.pipeline_mode<synchronous>, transform_indices = @transform_1, window_bounds = array<i64: 1, 32>}, {pipeline_mode = #tpu.pipeline_mode<synchronous>, transform_indices = @transform_2, window_bounds = array<i64: 1, 32>}, {transform_indices = @transform_3, window_bounds = array<i64: 32, 32>}, {transform_indices = @transform_4, window_bounds = array<i64: 1, 32>}, {transform_indices = @transform_5, window_bounds = array<i64: 16, 32>}]} {
    %c0 = arith.constant 0 : index
    %c0_0 = arith.constant 0 : index
    %0 = vector.load %arg2[%c0, %c0_0] : memref<16x32xf32, #tpu.memory_space<vmem>>, vector<16x32xf32>
    %cst = arith.constant dense<0.000000e+00> : vector<16xf32>
    %1 = vector.multi_reduction <add>, %0, %cst [1] : vector<16x32xf32> to vector<16xf32>
    %2 = vector.shape_cast %1 : vector<16xf32> to vector<16x1xf32>
    %cst_1 = arith.constant 3.200000e+01 : f32
    %3 = vector.broadcast %cst_1 : f32 to vector<16x1xf32>
    %4 = arith.divf %2, %3 : vector<16x1xf32>
    %5 = vector.broadcast %4 : vector<16x1xf32> to vector<16x32xf32>
    %6 = arith.subf %0, %5 : vector<16x32xf32>
    %7 = arith.mulf %6, %6 : vector<16x32xf32>
    %cst_2 = arith.constant dense<0.000000e+00> : vector<16xf32>
    %8 = vector.multi_reduction <add>, %7, %cst_2 [1] : vector<16x32xf32> to vector<16xf32>
    %9 = vector.shape_cast %8 : vector<16xf32> to vector<16x1xf32>
    %cst_3 = arith.constant 3.200000e+01 : f32
    %10 = vector.broadcast %cst_3 : f32 to vector<16x1xf32>
    %11 = arith.divf %9, %10 : vector<16x1xf32>
    %12 = vector.broadcast %4 : vector<16x1xf32> to vector<16x32xf32>
    %13 = arith.subf %0, %12 : vector<16x32xf32>
    %cst_4 = arith.constant 9.99999974E-6 : f32
    %14 = vector.broadcast %cst_4 : f32 to vector<16x1xf32>
    %15 = arith.addf %11, %14 : vector<16x1xf32>
    %16 = math.rsqrt %15 : vector<16x1xf32>
    %17 = vector.broadcast %16 : vector<16x1xf32> to vector<16x32xf32>
    %18 = arith.mulf %13, %17 : vector<16x32xf32>
    %c0_5 = arith.constant 0 : index
    %c0_6 = arith.constant 0 : index
    %19 = vector.load %arg3[%c0_5, %c0_6] : memref<1x32xf32, #tpu.memory_space<vmem>>, vector<1x32xf32>
    %20 = vector.broadcast %19 : vector<1x32xf32> to vector<16x32xf32>
    %21 = arith.mulf %18, %20 : vector<16x32xf32>
    %c0_7 = arith.constant 0 : index
    %c0_8 = arith.constant 0 : index
    %22 = vector.load %arg4[%c0_7, %c0_8] : memref<1x32xf32, #tpu.memory_space<vmem>>, vector<1x32xf32>
    %23 = vector.broadcast %22 : vector<1x32xf32> to vector<16x32xf32>
    %24 = arith.addf %21, %23 : vector<16x32xf32>
    %25 = arith.truncf %24 : vector<16x32xf32> to vector<16x32xbf16>
    %c0_9 = arith.constant 0 : index
    %c0_10 = arith.constant 0 : index
    %26 = vector.load %arg5[%c0_9, %c0_10] : memref<32x32xbf16, #tpu.memory_space<vmem>>, vector<32x32xbf16>
    %cst_11 = arith.constant dense<0.000000e+00> : vector<16x32xf32>
    %27 = tpu.matmul %25, %26, %cst_11 {dimension_numbers = #tpu.dot_dimension_numbers<[1], [0], [0], [1], [0, 0, 1, 1], [], []>} : vector<16x32xbf16>, vector<32x32xbf16>, vector<16x32xf32> -> vector<16x32xf32>
    %c0_12 = arith.constant 0 : index
    %c0_13 = arith.constant 0 : index
    %28 = vector.load %arg6[%c0_12, %c0_13] : memref<1x32xf32, #tpu.memory_space<vmem>>, vector<1x32xf32>
    %29 = vector.broadcast %28 : vector<1x32xf32> to vector<16x32xf32>
    %30 = arith.addf %27, %29 : vector<16x32xf32>
    %31 = arith.truncf %30 : vector<16x32xf32> to vector<16x32xbf16>
    %c0_14 = arith.constant 0 : index
    %c0_15 = arith.constant 0 : index
    %32 = vector.load %arg7[%c0_14, %c0_15] : memref<16x32xbf16, #tpu.memory_space<vmem>>, vector<16x32xbf16>
    tpu.vector_store %arg7[%c0_14, %c0_15], %31 {strides = array<i32>} : memref<16x32xbf16, #tpu.memory_space<vmem>>, vector<16x32xbf16>,
    return
  }
  func.func @transform_0(%arg0: i32, %arg1: i32) -> (i32, i32) {
    %c0_i32 = arith.constant 0 : i32
    %c0_i32_0 = arith.constant 0 : i32
    return %arg0, %c0_i32 : i32, i32
  }
  func.func @transform_1(%arg0: i32, %arg1: i32) -> (i32, i32) {
    %c0_i32 = arith.constant 0 : i32
    %c0_i32_0 = arith.constant 0 : i32
    %c0_i32_1 = arith.constant 0 : i32
    return %c0_i32, %c0_i32_0 : i32, i32
  }
  func.func @transform_2(%arg0: i32, %arg1: i32) -> (i32, i32) {
    %c0_i32 = arith.constant 0 : i32
    %c0_i32_0 = arith.constant 0 : i32
    %c0_i32_1 = arith.constant 0 : i32
    return %c0_i32, %c0_i32_0 : i32, i32
  }
  func.func @transform_3(%arg0: i32, %arg1: i32) -> (i32, i32) {
    %c0_i32 = arith.constant 0 : i32
    %c0_i32_0 = arith.constant 0 : i32
    return %c0_i32, %arg1 : i32, i32
  }
  func.func @transform_4(%arg0: i32, %arg1: i32) -> (i32, i32) {
    %c0_i32 = arith.constant 0 : i32
    %c0_i32_0 = arith.constant 0 : i32
    return %c0_i32, %arg1 : i32, i32
  }
  func.func @transform_5(%arg0: i32, %arg1: i32) -> (i32, i32) {
    %c0_i32 = arith.constant 0 : i32
    return %arg0, %arg1 : i32, i32
  }
}

module attributes {stable_mosaic.version = 11 : i64} {
  func.func @_matmul_bias_kernel(%arg0: i32, %arg1: i32, %arg2: i32, %arg3: memref<16x32xbf16, #tpu.memory_space<vmem>>, %arg4: memref<32x128xbf16, #tpu.memory_space<vmem>>, %arg5: memref<1x128xf32, #tpu.memory_space<vmem>>, %arg6: memref<16x128xf32, #tpu.memory_space<vmem>>, %arg7: memref<16x128xf32, #tpu.memory_space<vmem>>) attributes {dimension_semantics = [#tpu.dimension_semantics<parallel>, #tpu.dimension_semantics<parallel>, #tpu.dimension_semantics<arbitrary>], iteration_bounds = array<i64: 1, 1, 1>, scalar_prefetch = 0 : i64, scratch_operands = 1 : i64, tpu.core_type = #tpu.core_type<tc>, window_params = [{transform_indices = @transform_0, window_bounds = array<i64: 16, 32>}, {transform_indices = @transform_1, window_bounds = array<i64: 32, 128>}, {transform_indices = @transform_2, window_bounds = array<i64: 1, 128>}, {transform_indices = @transform_3, window_bounds = array<i64: 16, 128>}]} {
    %c0_i32 = arith.constant 0 : i32
    %0 = arith.cmpi eq, %arg2, %c0_i32 : i32
    %1 = arith.extui %0 : i1 to i32
    %c0_i32_0 = arith.constant 0 : i32
    %2 = arith.cmpi ne, %1, %c0_i32_0 : i32
    scf.if %2 {
      %cst_10 = arith.constant 0.000000e+00 : f32
      %12 = vector.broadcast %cst_10 : f32 to vector<16x128xf32>
      %c0_11 = arith.constant 0 : index
      %c0_12 = arith.constant 0 : index
      %13 = vector.load %arg7[%c0_11, %c0_12] : memref<16x128xf32, #tpu.memory_space<vmem>>, vector<16x128xf32>
      tpu.vector_store %arg7[%c0_11, %c0_12], %12 {strides = array<i32>} : memref<16x128xf32, #tpu.memory_space<vmem>>, vector<16x128xf32>,
    } else {
    }
    %c0 = arith.constant 0 : index
    %c0_1 = arith.constant 0 : index
    %3 = vector.load %arg7[%c0, %c0_1] : memref<16x128xf32, #tpu.memory_space<vmem>>, vector<16x128xf32>
    %c0_2 = arith.constant 0 : index
    %c0_3 = arith.constant 0 : index
    %4 = vector.load %arg3[%c0_2, %c0_3] : memref<16x32xbf16, #tpu.memory_space<vmem>>, vector<16x32xbf16>
    %c0_4 = arith.constant 0 : index
    %c0_5 = arith.constant 0 : index
    %5 = vector.load %arg4[%c0_4, %c0_5] : memref<32x128xbf16, #tpu.memory_space<vmem>>, vector<32x128xbf16>
    %cst = arith.constant dense<0.000000e+00> : vector<16x128xf32>
    %6 = tpu.matmul %4, %5, %cst {dimension_numbers = #tpu.dot_dimension_numbers<[1], [0], [0], [1], [0, 0, 1, 1], [], []>} : vector<16x32xbf16>, vector<32x128xbf16>, vector<16x128xf32> -> vector<16x128xf32>
    %7 = arith.addf %3, %6 : vector<16x128xf32>
    %c0_6 = arith.constant 0 : index
    %c0_7 = arith.constant 0 : index
    %8 = vector.load %arg7[%c0_6, %c0_7] : memref<16x128xf32, #tpu.memory_space<vmem>>, vector<16x128xf32>
    tpu.vector_store %arg7[%c0_6, %c0_7], %7 {strides = array<i32>} : memref<16x128xf32, #tpu.memory_space<vmem>>, vector<16x128xf32>,
    %c0_i32_8 = arith.constant 0 : i32
    %9 = arith.cmpi eq, %arg2, %c0_i32_8 : i32
    %10 = arith.extui %9 : i1 to i32
    %c0_i32_9 = arith.constant 0 : i32
    %11 = arith.cmpi ne, %10, %c0_i32_9 : i32
    scf.if %11 {
      %c0_10 = arith.constant 0 : index
      %c0_11 = arith.constant 0 : index
      %12 = vector.load %arg7[%c0_10, %c0_11] : memref<16x128xf32, #tpu.memory_space<vmem>>, vector<16x128xf32>
      %c0_12 = arith.constant 0 : index
      %c0_13 = arith.constant 0 : index
      %13 = vector.load %arg5[%c0_12, %c0_13] : memref<1x128xf32, #tpu.memory_space<vmem>>, vector<1x128xf32>
      %14 = vector.broadcast %13 : vector<1x128xf32> to vector<16x128xf32>
      %15 = arith.addf %12, %14 : vector<16x128xf32>
      %c0_14 = arith.constant 0 : index
      %c0_15 = arith.constant 0 : index
      %16 = vector.load %arg6[%c0_14, %c0_15] : memref<16x128xf32, #tpu.memory_space<vmem>>, vector<16x128xf32>
      tpu.vector_store %arg6[%c0_14, %c0_15], %15 {strides = array<i32>} : memref<16x128xf32, #tpu.memory_space<vmem>>, vector<16x128xf32>,
    } else {
    }
    return
  }
  func.func @transform_0(%arg0: i32, %arg1: i32, %arg2: i32) -> (i32, i32) {
    %c0_i32 = arith.constant 0 : i32
    return %arg0, %arg2 : i32, i32
  }
  func.func @transform_1(%arg0: i32, %arg1: i32, %arg2: i32) -> (i32, i32) {
    %c0_i32 = arith.constant 0 : i32
    return %arg2, %arg1 : i32, i32
  }
  func.func @transform_2(%arg0: i32, %arg1: i32, %arg2: i32) -> (i32, i32) {
    %c0_i32 = arith.constant 0 : i32
    %c0_i32_0 = arith.constant 0 : i32
    return %c0_i32, %arg1 : i32, i32
  }
  func.func @transform_3(%arg0: i32, %arg1: i32, %arg2: i32) -> (i32, i32) {
    %c0_i32 = arith.constant 0 : i32
    return %arg0, %arg1 : i32, i32
  }
}

</mosaic_0001>

<bundles_post_ra>
// kernel: _lambda_.27
= control target key start
LH: loop header
LB: loop body
LE: loop exit
PB: predicated region body
PF: predicated region fallthrough
CT: control target
= control target key end

     0   :  { %vm23_vm0 = vcmask 261120   ;;  %v181_v15 = vmov 0.0   ;;  %vm182_vm1 = vmmov 0   ;;  %vm145_vm2 = vcmask 781312   ;;  %s245_s0 = inlined_call_operand.vmem [shape: f32[16,32], index: 0, kind: input, shape index: {}]   ;;  %s246_s3 = inlined_call_operand.vmem [shape: bf16[32,96], index: 3, kind: input, shape index: {}]   ;;  %s247_s1 = inlined_call_operand.vmem [shape: f32[1,32], index: 1, kind: input, shape index: {}]   ;;  %s248_s2 = inlined_call_operand.vmem [shape: f32[1,32], index: 2, kind: input, shape index: {}]   ;;  %s249_s4 = inlined_call_operand.vmem [shape: f32[1,96], index: 4, kind: input, shape index: {}]   ;;  %s250_s5 = inlined_call_operand.vmem [shape: bf16[16,96], index: 5, kind: output, shape index: {}]  }
   0x1   :  { %v21_v0 = vld [vmem:[%s245_s0] sm:$0xff]  ;;  %v22_v1 = vld [vmem:[%s245_s0 + $0x8] sm:$0xff]  ;;  %165 = vmatprep.subr.bf16.mxu0 %v181_v15  ;;  %169 = vmatprep.mubr.msk.bf16.mxu0 %vm182_vm1, %v181_v15 }
   0x2   :  { %v24_v2 = vsel %vm23_vm0, %v21_v0, 0.0  ;;  %v27_v3 = vsel %vm23_vm0, %v22_v1, 0.0  ;;  %v175_v14 = vld [vmem:[%s246_s3] sm:$0xff]   ;;  %v176_v16 = vld [vmem:[%s246_s3 + $0x8] sm:$0xff]  }
   0x3   :  { %25 = vadd.xlane.f32.xlu0 %v24_v2  ;;  %166 = vmatpush3.bf16.msra.mxu0 %v175_v14  ;;  %v152_v25 = vld [vmem:[%s247_s1] ss:$0 sm:$0xff] }
   0x4   :  { %167 = vmatprep.subr.bf16.mxu0 %v181_v15  ;;  %v153_v29 = vld [vmem:[%s248_s2] ss:$0 sm:$0xff] }
   0x5   :  { %v154_v34 = vld [vmem:[%s249_s4] ss:$0 sm:$0xff] }
   0x7   :  { %28 = vadd.xlane.f32.xlu0 %v27_v3  ;;  %168 = vmatpush3.bf16.msra.mxu0 %v176_v16 }
  0x90   :  { %v26_v4 = vpop.xlane.xlu0 %25 }
  0x91   :  { %v31_v5 = vmul.f32 0.03125, %v26_v4 }
  0x93   :  { %v33_v6 = vsub.f32 %v21_v0, %v31_v5 }
  0x94   :  { %v29_v7 = vpop.xlane.xlu0 %28 }
  0x95   :  { %v32_v8 = vmul.f32 0.03125, %v29_v7  ;;  %v35_v9 = vmul.f32 %v33_v6, %v33_v6 }
  0x97   :  { %v34_v10 = vsub.f32 %v22_v1, %v32_v8  ;;  %v37_v11 = vsel %vm23_vm0, %v35_v9, 0.0 }
  0x98   :  { %38 = vadd.xlane.f32.xlu1 %v37_v11 }
  0x99   :  { %v36_v12 = vmul.f32 %v34_v10, %v34_v10 }
  0x9b   :  { %v40_v13 = vsel %vm23_vm0, %v36_v12, 0.0 }
  0x9c   :  { %41 = vadd.xlane.f32.xlu1 %v40_v13 }
 0x125   :  { %v39_v17 = vpop.xlane.xlu1 %38 }
 0x126   :  { %v43_v18 = vmul.f32 0.03125, %v39_v17 }
 0x128   :  { %v45_v19 = vadd.f32 1e-05, %v43_v18 }
 0x129   :  { %v42_v20 = vpop.xlane.xlu1 %41 }
 0x12a   :  { %177 = vrsqrt.f32 %v45_v19  ;;  %v44_v21 = vmul.f32 0.03125, %v42_v20 }
 0x12c   :  { %v46_v22 = vadd.f32 1e-05, %v44_v21 }
 0x12e   :  { %179 = vrsqrt.f32 %v46_v22 }
 0x134   :  { %v178_v23 = vpop.eup %177 }
 0x135   :  { %v49_v24 = vmul.f32 %v178_v23, %v33_v6 }
 0x137   :  { %v58_v28 = vmul.f32 %v152_v25, %v49_v24 }
 0x138   :  { %v180_v26 = vpop.eup %179 }
 0x139   :  { %v50_v27 = vmul.f32 %v180_v26, %v34_v10  ;;  %v67_v31 = vadd.f32 %v153_v29, %v58_v28 }
 0x13b   :  { %v59_v30 = vmul.f32 %v152_v25, %v50_v27 }
 0x13d   :  { %v68_v32 = vadd.f32 %v153_v29, %v59_v30 }
 0x13f   :  { %v69_v33 = vpack.c.bf16 %v68_v32, %v67_v31 }
 0x141   :  { %170 = vmatmul.mubr.msk.bf16.vlgmr.msra.gmra.mrb[0].mxu0 %vm23_vm0, %v69_v33 }
 0x214   :  { %v130_v35 = vpop.f32.mrb[0].mxu0 }
 0x215   :  { %v131_v36 = vadd.f32 %v154_v34, %v130_v35  ;;  %v171_v37 = vpop.f32.mrb[1].mxu0 }
 0x216   :  { %v133_v38 = vpop.f32.mrb[2].mxu0 }
 0x217   :  { %v160_v39 = vpack.c.bf16 %v131_v36, %v131_v36  ;;  %v134_v40 = vadd.f32 %v154_v34, %v133_v38  ;;  %v172_v41 = vpop.f32.mrb[3].mxu0 }
 0x219   :  { %146 = vst.msk [vmem:[%s250_s5] sm:$0xf] %vm145_vm2, %v160_v39  ;;  %v161_v42 = vpack.c.bf16 %v134_v40, %v134_v40 }
 0x21b   :  { %147 = vst.msk [vmem:[%s250_s5 + $0x4] sm:$0xf] %vm145_vm2, %v161_v42 }

// kernel: _lambda_.29
= control target key start
LH: loop header
LB: loop body
LE: loop exit
PB: predicated region body
PF: predicated region fallthrough
CT: control target
= control target key end

     0   :  { %v124_v0 = vmov 0.0   ;;  %vm125_vm0 = vmmov 0   ;;  %vm48_vm1 = vcmask 261120   ;;  %s178_s1 = inlined_call_operand.vmem [shape: bf16[32,32], index: 1, kind: input, shape index: {}]   ;;  %s179_s0 = inlined_call_operand.vmem [shape: bf16[16,32], index: 0, kind: input, shape index: {}]   ;;  %s180_s2 = inlined_call_operand.vmem [shape: f32[1,32], index: 2, kind: input, shape index: {}]   ;;  %s181_s3 = inlined_call_operand.vmem [shape: f32[16,32], index: 3, kind: input, shape index: {}]   ;;  %s182_s4 = inlined_call_operand.vmem [shape: f32[16,32], index: 4, kind: output, shape index: {}]  }
   0x1   :  { %111 = vmatprep.subr.bf16.mxu0 %v124_v0  ;;  %v121_v1 = vld [vmem:[%s178_s1] sm:$0xff]   ;;  %115 = vmatprep.mubr.msk.bf16.mxu0 %vm125_vm0, %v124_v0  ;;  %v122_v2 = vld [vmem:[%s178_s1 + $0x8] sm:$0xff]  }
   0x2   :  { %112 = vmatpush3.bf16.msra.mxu0 %v121_v1  ;;  %v123_v3 = vld [vmem:[%s179_s0] sm:$0xff]   ;;  %v94_v10 = vld [vmem:[%s181_s3 + $0x8] sm:$0xff] }
   0x3   :  { %113 = vmatprep.subr.bf16.mxu0 %v124_v0  ;;  %v103_v4 = vld [vmem:[%s180_s2] ss:$0 sm:$0xff] }
   0x4   :  { %v93_v6 = vld [vmem:[%s181_s3] sm:$0xff] }
   0x6   :  { %114 = vmatpush3.bf16.msra.mxu0 %v122_v2 }
   0x9   :  { %116 = vmatmul.mubr.msk.bf16.vlgmr.msra.gmra.mrb[0].mxu0 %vm48_vm1, %v123_v3 }
  0xdc   :  { %v86_v5 = vpop.f32.mrb[0].mxu0 }
  0xdd   :  { %v87_v7 = vadd.f32 %v103_v4, %v86_v5  ;;  %v117_v8 = vpop.f32.mrb[1].mxu0 }
  0xde   :  { %v89_v9 = vpop.f32.mrb[2].mxu0 }
  0xdf   :  { %v95_v11 = vadd.f32 %v93_v6, %v87_v7  ;;  %v90_v12 = vadd.f32 %v103_v4, %v89_v9  ;;  %v118_v13 = vpop.f32.mrb[3].mxu0 }
  0xe1   :  { %97 = vst.msk [vmem:[%s182_s4] sm:$0xff] %vm48_vm1, %v95_v11  ;;  %v96_v14 = vadd.f32 %v94_v10, %v90_v12 }
  0xe3   :  { %98 = vst.msk [vmem:[%s182_s4 + $0x8] sm:$0xff] %vm48_vm1, %v96_v14 }

// kernel: _lambda_.30
= control target key start
LH: loop header
LB: loop body
LE: loop exit
PB: predicated region body
PF: predicated region fallthrough
CT: control target
= control target key end

     0   :  { %vm33_vm0 = vcmask 261120   ;;  %v381_v15 = vmov 0.0   ;;  %vm382_vm1 = vmmov 0   ;;  %s499_s0 = inlined_call_operand.vmem [shape: f32[16,32], index: 0, kind: input, shape index: {}]   ;;  %s500_s3 = inlined_call_operand.vmem [shape: bf16[32,128], index: 3, kind: input, shape index: {}]   ;;  %s501_s1 = inlined_call_operand.vmem [shape: f32[1,32], index: 1, kind: input, shape index: {}]   ;;  %s502_s2 = inlined_call_operand.vmem [shape: f32[1,32], index: 2, kind: input, shape index: {}]   ;;  %s503_s5 = inlined_call_operand.vmem [shape: bf16[128,32], index: 5, kind: input, shape index: {}]   ;;  %s504_s4 = inlined_call_operand.vmem [shape: f32[1,128], index: 4, kind: input, shape index: {}]   ;;  %s505_s6 = inlined_call_operand.vmem [shape: f32[1,32], index: 6, kind: input, shape index: {}]   ;;  %s506_s7 = inlined_call_operand.vmem [shape: f32[16,32], index: 7, kind: output, shape index: {}]  }
   0x1   :  { %v426_v0 = vld [vmem:[%s499_s0] sm:$0xff]  ;;  %v431_v1 = vld [vmem:[%s499_s0 + $0x8] sm:$0xff]  ;;  %333 = vmatprep.subr.bf16.mxu0 %v381_v15  ;;  %81 = vst.msk [vmem:[#allocation3] sm:$0xff] %vm33_vm0, %v381_v15  ;;  %82 = vst.msk [vmem:[#allocation3 + $0x8] sm:$0xff] %vm33_vm0, %v381_v15  ;;  %341 = vmatprep.subr.bf16.mxu1 %v381_v15 }
   0x2   :  { %v34_v2 = vsel %vm33_vm0, %v426_v0, 0.0  ;;  %v37_v3 = vsel %vm33_vm0, %v431_v1, 0.0  ;;  %v363_v14 = vld [vmem:[%s500_s3] sm:$0xff]   ;;  %v364_v16 = vld [vmem:[%s500_s3 + $0x8] sm:$0xff]   ;;  %337 = vmatprep.mubr.msk.bf16.mxu0 %vm382_vm1, %v381_v15  ;;  %357 = vmatprep.mubr.msk.bf16.mxu1 %vm382_vm1, %v381_v15  ;;  %v367_v37 = vld [vmem:[%s503_s5 + $0x10] sm:$0xff]  }
   0x3   :  { %35 = vadd.xlane.f32.xlu0 %v34_v2  ;;  %334 = vmatpush3.bf16.msra.mxu0 %v363_v14  ;;  %v306_v25 = vld [vmem:[%s501_s1] ss:$0 sm:$0xff]  ;;  %v366_v36 = vld [vmem:[%s503_s5 + $0x8] sm:$0xff]   ;;  %v368_v38 = vld [vmem:[%s503_s5 + $0x18] sm:$0xff]  }
   0x4   :  { %335 = vmatprep.subr.bf16.mxu0 %v381_v15  ;;  %v307_v29 = vld [vmem:[%s502_s2] ss:$0 sm:$0xff]  ;;  %v370_v40 = vld [vmem:[%s503_s5 + $0x28] sm:$0xff]   ;;  %v371_v41 = vld [vmem:[%s503_s5 + $0x30] sm:$0xff]  }
   0x5   :  { %v365_v35 = vld [vmem:[%s503_s5] sm:$0xff]   ;;  %v372_v42 = vld [vmem:[%s503_s5 + $0x38] sm:$0xff]  }
   0x6   :  { %342 = vmatpush3.bf16.msra.mxu1 %v365_v35  ;;  %v369_v39 = vld [vmem:[%s503_s5 + $0x20] sm:$0xff]  }
   0x7   :  { %38 = vadd.xlane.f32.xlu0 %v37_v3  ;;  %336 = vmatpush3.bf16.msra.mxu0 %v364_v16  ;;  %v308_v43 = vld [vmem:[%s504_s4] ss:$0 sm:$0xff] }
   0x8   :  { %343 = vmatprep.subr.bf16.mxu1 %v381_v15 }
   0xa   :  { %344 = vmatpush3.bf16.msra.mxu1 %v366_v36 }
   0xb   :  { %345 = vmatprep.subr.bf16.mxu1 %v381_v15 }
   0xe   :  { %346 = vmatpush3.bf16.msra.mxu1 %v367_v37 }
   0xf   :  { %347 = vmatprep.subr.bf16.mxu1 %v381_v15 }
  0x12   :  { %348 = vmatpush3.bf16.msra.mxu1 %v368_v38 }
  0x13   :  { %349 = vmatprep.subr.bf16.mxu1 %v381_v15 }
  0x16   :  { %350 = vmatpush3.bf16.msra.mxu1 %v369_v39 }
  0x17   :  { %351 = vmatprep.subr.bf16.mxu1 %v381_v15 }
  0x1a   :  { %352 = vmatpush3.bf16.msra.mxu1 %v370_v40 }
  0x1b   :  { %353 = vmatprep.subr.bf16.mxu1 %v381_v15 }
  0x1e   :  { %354 = vmatpush3.bf16.msra.mxu1 %v371_v41 }
  0x1f   :  { %355 = vmatprep.subr.bf16.mxu1 %v381_v15  ;;  %v320_v15 = vld [vmem:[%s505_s6] ss:$0 sm:$0xff] }
  0x22   :  { %356 = vmatpush3.bf16.msra.mxu1 %v372_v42 }
  0x90   :  { %v36_v4 = vpop.xlane.xlu0 %35 }
  0x91   :  { %v41_v5 = vmul.f32 0.03125, %v36_v4 }
  0x93   :  { %v43_v6 = vsub.f32 %v426_v0, %v41_v5 }
  0x94   :  { %v39_v7 = vpop.xlane.xlu0 %38 }
  0x95   :  { %v42_v8 = vmul.f32 0.03125, %v39_v7  ;;  %v45_v9 = vmul.f32 %v43_v6, %v43_v6  ;;  %v170_v7 = vld [vmem:[#allocation3] sm:$0xff] }
  0x97   :  { %v44_v10 = vsub.f32 %v431_v1, %v42_v8  ;;  %v47_v11 = vsel %vm33_vm0, %v45_v9, 0.0  ;;  %v171_v9 = vld [vmem:[#allocation3 + $0x8] sm:$0xff] }
  0x98   :  { %48 = vadd.xlane.f32.xlu1 %v47_v11 }
  0x99   :  { %v46_v12 = vmul.f32 %v44_v10, %v44_v10 }
  0x9b   :  { %v50_v13 = vsel %vm33_vm0, %v46_v12, 0.0 }
  0x9c   :  { %51 = vadd.xlane.f32.xlu1 %v50_v13 }
 0x125   :  { %v49_v17 = vpop.xlane.xlu1 %48 }
 0x126   :  { %v53_v18 = vmul.f32 0.03125, %v49_v17 }
 0x128   :  { %v55_v19 = vadd.f32 1e-05, %v53_v18 }
 0x129   :  { %v52_v20 = vpop.xlane.xlu1 %51 }
 0x12a   :  { %373 = vrsqrt.f32 %v55_v19  ;;  %v54_v21 = vmul.f32 0.03125, %v52_v20 }
 0x12c   :  { %v56_v22 = vadd.f32 1e-05, %v54_v21 }
 0x12e   :  { %375 = vrsqrt.f32 %v56_v22 }
 0x134   :  { %v374_v23 = vpop.eup %373 }
 0x135   :  { %v59_v24 = vmul.f32 %v374_v23, %v43_v6 }
 0x137   :  { %v68_v27 = vmul.f32 %v306_v25, %v59_v24 }
 0x138   :  { %v376_v26 = vpop.eup %375 }
 0x139   :  { %v60_v28 = vmul.f32 %v376_v26, %v44_v10  ;;  %v77_v31 = vadd.f32 %v307_v29, %v68_v27 }
 0x13b   :  { %v69_v30 = vmul.f32 %v306_v25, %v60_v28 }
 0x13d   :  { %v78_v32 = vadd.f32 %v307_v29, %v69_v30 }
 0x13f   :  { %v79_v33 = vpack.c.bf16 %v78_v32, %v77_v31 }
 0x141   :  { %80 = vst.msk [vmem:[#allocation2] sm:$0xff] %vm33_vm0, %v79_v33 }
 0x148   :  { %v83_v34 = vld [vmem:[#allocation2] sm:$0xff] }
 0x149   :  { %338 = vmatmul.mubr.msk.bf16.vlgmr.msra.gmra.mrb[0].mxu0 %vm33_vm0, %v83_v34 }
 0x21c   :  { %v145_v44 = vpop.f32.mrb[0].mxu0 }
 0x21d   :  { %v146_v45 = vadd.f32 %v308_v43, %v145_v44  ;;  %v339_v46 = vpop.f32.mrb[1].mxu0 }
 0x21e   :  { %v148_v47 = vpop.f32.mrb[2].mxu0 }
 0x21f   :  { %v152_v48 = vmul.f32 %v146_v45, %v146_v45  ;;  %v149_v49 = vadd.f32 %v308_v43, %v148_v47  ;;  %v340_v50 = vpop.f32.mrb[3].mxu0 }
 0x221   :  { %v154_v51 = vmul.f32 %v152_v48, %v146_v45  ;;  %v153_v52 = vmul.f32 %v149_v49, %v149_v49 }
 0x223   :  { %v156_v53 = vmul.f32 0.044715, %v154_v51  ;;  %v155_v54 = vmul.f32 %v153_v52, %v149_v49 }
 0x225   :  { %v158_v55 = vadd.f32 %v156_v53, %v146_v45  ;;  %v157_v56 = vmul.f32 0.044715, %v155_v54 }
 0x227   :  { %v160_v57 = vmul.f32 0.7978846, %v158_v55  ;;  %v159_v58 = vadd.f32 %v157_v56, %v149_v49 }
 0x229   :  { %377 = vtanh.f32 %v160_v57  ;;  %v161_v59 = vmul.f32 0.7978846, %v159_v58 }
 0x22b   :  { %379 = vtanh.f32 %v161_v59 }
 0x233   :  { %v378_v60 = vpop.eup %377 }
 0x234   :  { %v164_v61 = vadd.f32 1.0, %v378_v60 }
 0x235   :  { %v380_v62 = vpop.eup %379 }
 0x236   :  { %v165_v63 = vadd.f32 1.0, %v380_v62  ;;  %v166_v2 = vmul.f32 0.5, %v164_v61 }
 0x238   :  { %v167_v3 = vmul.f32 0.5, %v165_v63  ;;  %v168_v4 = vmul.f32 %v166_v2, %v146_v45 }
 0x23a   :  { %v169_v5 = vmul.f32 %v167_v3, %v149_v49 }
 0x23c   :  { %v172_v6 = vpack.c.bf16 %v169_v5, %v168_v4 }
 0x23e   :  { %358 = vmatmul.mubr.bf16.vlgmr.msra.gmra.mrb[0].mxu1 %v172_v6 }
 0x311   :  { %v271_v8 = vpop.f32.mrb[0].mxu1 }
 0x312   :  { %v278_v10 = vadd.f32 %v271_v8, %v170_v7  ;;  %v359_v11 = vpop.f32.mrb[1].mxu1 }
 0x313   :  { %v274_v12 = vpop.f32.mrb[2].mxu1 }
 0x314   :  { %280 = vst.msk [vmem:[#allocation3] sm:$0xff] %vm33_vm0, %v278_v10  ;;  %v279_v13 = vadd.f32 %v274_v12, %v171_v9  ;;  %v360_v14 = vpop.f32.mrb[3].mxu1 }
 0x316   :  { %281 = vst.msk [vmem:[#allocation3 + $0x8] sm:$0xff] %vm33_vm0, %v279_v13 }
 0x31b   :  { %v285_v16 = vld [vmem:[#allocation3] sm:$0xff] }
 0x31c   :  { %v294_v17 = vadd.f32 %v320_v15, %v285_v16 }
 0x31d   :  { %v286_v18 = vld [vmem:[#allocation3 + $0x8] sm:$0xff] }
 0x31e   :  { %v298_v19 = vadd.f32 %v294_v17, %v426_v0  ;;  %v295_v20 = vadd.f32 %v320_v15, %v286_v18 }
 0x320   :  { %300 = vst.msk [vmem:[%s506_s7] sm:$0xff] %vm33_vm0, %v298_v19  ;;  %v299_v21 = vadd.f32 %v431_v1, %v295_v20 }
 0x322   :  { %301 = vst.msk [vmem:[%s506_s7 + $0x8] sm:$0xff] %vm33_vm0, %v299_v21 }

// kernel: _lambda_.28
= control target key start
LH: loop header
LB: loop body
LE: loop exit
PB: predicated region body
PF: predicated region fallthrough
CT: control target
= control target key end

     0   :  { %s905_s12 = smov 0   ;;  %s1000_s0 = inlined_call_operand.vmem [shape: bf16[2,8,32], index: 0, kind: input, shape index: {}]   ;;  %s1001_s1 = inlined_call_operand.vmem [shape: bf16[2,8,32], index: 1, kind: input, shape index: {}]   ;;  %s1002_s2 = inlined_call_operand.vmem [shape: bf16[2,8,32], index: 2, kind: input, shape index: {}]   ;;  %s1003_s3 = inlined_call_operand.vmem [shape: bf16[2,8,32], index: 3, kind: output, shape index: {}]  }
   0x1 LB: > { %s750_s13 = sadd.s32 4294967295, %s875_s12   ;;  %p754_p0 = scmp.ge.s32.totalorder %s875_s12, 1  ;;  %s875_s12 = sphi %s905_s12, %s13_s12  }
   0x2   : > { %p154_p1 = scmp.lt.s32.totalorder %s875_s12, 3 }
   0x4   : > { %p155_p2 = pnand %p754_p0, %p154_p1 }
   0x5   : > { %p184_p3 = scmp.lt.s32.totalorder (!%p155_p2), %s750_s13, 1  ;;  %v877_v0 = vmov (!%p155_p2), 0.0   ;;  %vm878_vm0 = vmmov (!%p155_p2), 0   ;;  %vm207_vm1 = vcmask (!%p155_p2), 64512   ;;  %s879_s21 = smov (!%p155_p2), 120   ;;  %vm267_vm2 = vcmask (!%p155_p2), 1043456  }
   0x6   : > { %158 = sbr.rel (%p155_p2) target bundleno = 1170 (0x492), region = 32  ;;  %787 = vmatprep.subr.bf16.mxu0 (!%p155_p2), %v877_v0  ;;  %789 = vmatprep.mubr.msk.bf16.mxu0 (!%p155_p2), %vm878_vm0, %v877_v0  ;;  %s880_s22 = smov (!%p155_p2), 112   ;;  %vm435_vm3 = vcmask (!%p155_p2), 130112   ;;  %vm551_vm4 = vcmask (!%p155_p2), 195712   ;;  %vm667_vm5 = vcmask (!%p155_p2), 261312   ;;  %vm671_vm6 = vcmask (!%p155_p2), 257024  }
   0x7   : > { %793 = vmatprep.subr.bf16.mxu1 (!%p155_p2), %v877_v0  ;;  %795 = vmatprep.mubr.msk.bf16.mxu1 (!%p155_p2), %vm878_vm0, %v877_v0  ;;  %s881_s23 = smov (!%p155_p2), 104   ;;  %s882_s27 = smov (!%p155_p2), 8  }
   0x8   : > { %s883_s28 = smov (!%p155_p2), 16   ;;  %s884_s29 = smov (!%p155_p2), 24  }
   0xd   : > { %s1005_s13 = smov (!%p184_p3, %s750_s13), 1 }
   0xe   : > { %s919_s14 = sshll.u32 %s1005_s13, 2 }
   0xf   : > { %s191_s17 = scalar_lea.vmem %s1001_s1, %s919_s14  ;;  %s187_s20 = scalar_lea.vmem %s1000_s0, %s919_s14 }
  0x10   : > { %v202_v1 = vld [vmem:[%s191_s17] sm:$0xf]  ;;  %s195_s26 = scalar_lea.vmem %s1002_s2, %s919_s14  ;;  %s199_s5 = scalar_lea.vmem %s1003_s3, %s919_s14 }
  0x11   : > { %v212_v2 = vsel %vm207_vm1, %v202_v1, 0  ;;  %v201_v3 = vld [vmem:[%s187_s20] sm:$0xf]  ;;  %v761_v7 = vcombine.low %v202_v1, %v202_v1 }
  0x12   : > { %788 = vmatpush3.bf16.xpose.msra.mxu0 %v212_v2  ;;  %v204_v4 = vunpack.c.l.bf16 %v201_v3  ;;  %v203_v13 = vld [vmem:[%s195_s26] sm:$0xf] }
  0x13   : > { %805 = vmatprep.subr.bf16.mxu0 %v877_v0  ;;  %v269_v14 = vsel %vm267_vm2, %v203_v13, 0  ;;  %v763_v43 = vcombine.low %v203_v13, %v203_v13 }
  0x14   : > { %v205_v5 = vmul.f32 0.35355338, %v204_v4  ;;  %794 = vmatpush3.bf16.msra.mxu1 %v269_v14 }
  0x15   : > { %799 = vmatprep.subr.bf16.mxu1 %v877_v0 }
  0x16   : > { %v206_v6 = vpack.c.bf16 %v205_v5, %v205_v5 }
  0x18   : > { %315 = vrot.lane.b32.xlu1 %v206_v6, %s879_s21 }
  0x19   : > { %790 = vmatmul.mubr.msk.bf16.vlgmr.msra.gmra.mrb[0].mxu0 %vm207_vm1, %v206_v6 }
  0x1a   : > { %807 = vmatprep.mubr.msk.bf16.mxu0 %vm878_vm0, %v877_v0 }
  0x1c   : > { %439 = vrot.lane.b32.xlu1 %v761_v7, %s880_s22 }
  0x20   : > { %437 = vrot.lane.b32.xlu1 %v206_v6, %s880_s22 }
  0x24   : > { %555 = vrot.lane.b32.xlu1 %v761_v7, %s881_s23 }
  0x28   : > { %553 = vrot.lane.b32.xlu1 %v206_v6, %s881_s23 }
  0x8a   : > { %v316_v20 = vpop.permute.xlu1 %315 }
  0x8e   : > { %v440_v23 = vpop.permute.xlu1 %439 }
  0x8f   : > { %v445_v24 = vsel %vm207_vm1, %v440_v23, 0 }
  0x92   : > { %v438_v25 = vpop.permute.xlu1 %437 }
  0x96   : > { %v556_v26 = vpop.permute.xlu1 %555 }
  0x97   : > { %v561_v27 = vsel %vm207_vm1, %v556_v26, 0 }
  0x9a   : > { %v554_v28 = vpop.permute.xlu1 %553 }
  0xec   : > { %v248_v8 = vpop.f32.mrb[0].mxu0 }
  0xed   : > { %v791_v9 = vpop.f32.mrb[1].mxu0  ;;  %v254_v10 = vsel %vm207_vm1, %v248_v8, -inf }
  0xee   : > { %255 = vmax.xlane.f32.xlu0 %v254_v10  ;;  %v251_v11 = vpop.f32.mrb[2].mxu0 }
  0xef   : > { %v792_v12 = vpop.f32.mrb[3].mxu0 }
 0x104   : > { %320 = vrot.lane.b32.xlu0 %v761_v7, %s879_s21 }
 0x17b   : > { %v256_v15 = vpop.xlane.xlu0 %255 }
 0x17c   : > { %v257_v16 = vsub.f32 %v248_v8, %v256_v15 }
 0x17e   : > { %v258_v17 = vmul.f32 1.442695, %v257_v16 }
 0x17f   : > { %v321_v18 = vpop.permute.xlu0 %320 }
 0x180   : > { %853 = vpow2.f32 %v258_v17  ;;  %v326_v21 = vsel %vm207_vm1, %v321_v18, 0 }
 0x18a   : > { %v947_v19 = vpop.eup %853 }
 0x18b   : > { %v263_v22 = vpack.c.bf16 %v947_v19, %v947_v19  ;;  %v260_v10 = vsel %vm207_vm1, %v947_v19, 0.0 }
 0x18d   : > { %796 = vmatmul.mubr.msk.bf16.vlgmr.msra.gmra.mrb[0].mxu1 %vm207_vm1, %v263_v22 }
 0x18e   : > { %800 = vmatpush3.bf16.xpose.msra.mxu1 %v326_v21  ;;  %801 = vmatprep.mubr.msk.bf16.mxu1 %vm878_vm0, %v877_v0 }
 0x18f   : > { %811 = vmatprep.subr.bf16.mxu1 %v877_v0 }
 0x195   : > { %802 = vmatmul.mubr.msk.bf16.vlgmr.msra.gmra.mrb[4].mxu1 %vm207_vm1, %v316_v20 }
 0x196   : > { %812 = vmatpush3.bf16.xpose.msra.mxu1 %v445_v24  ;;  %813 = vmatprep.mubr.msk.bf16.mxu1 %vm878_vm0, %v877_v0 }
 0x197   : > { %823 = vmatprep.subr.bf16.mxu1 %v877_v0 }
 0x19d   : > { %814 = vmatmul.mubr.msk.bf16.vlgmr.msra.gmra.mrb[8].mxu1 %vm207_vm1, %v438_v25 }
 0x19e   : > { %824 = vmatpush3.bf16.xpose.msra.mxu1 %v561_v27  ;;  %825 = vmatprep.mubr.msk.bf16.mxu1 %vm878_vm0, %v877_v0 }
 0x1a5   : > { %826 = vmatmul.mubr.msk.bf16.vlgmr.msra.gmra.mrb[12].mxu1 %vm207_vm1, %v554_v28 }
 0x260   : > { %v966_v29 = vpop.f32.mrb[0].mxu1 }
 0x261   : > { %v797_v30 = vpop.f32.mrb[1].mxu1 }
 0x262   : > { %v308_v31 = vpop.f32.mrb[2].mxu1 }
 0x263   : > { %v798_v32 = vpop.f32.mrb[3].mxu1 }
 0x268   : > { %v362_v33 = vpop.f32.mrb[4].mxu1 }
 0x269   : > { %v803_v34 = vpop.f32.mrb[5].mxu1  ;;  %v368_v35 = vsel %vm207_vm1, %v362_v33, -inf }
 0x26a   : > { %369 = vmax.xlane.f32.xlu1 %v368_v35  ;;  %v365_v36 = vpop.f32.mrb[6].mxu1 }
 0x26b   : > { %v804_v37 = vpop.f32.mrb[7].mxu1 }
 0x270   : > { %v481_v38 = vpop.f32.mrb[8].mxu1 }
 0x271   : > { %v487_v39 = vsel %vm207_vm1, %v481_v38, -inf  ;;  %v815_v40 = vpop.f32.mrb[9].mxu1 }
 0x272   : > { %488 = vmax.xlane.f32.xlu0 %v487_v39  ;;  %v484_v41 = vpop.f32.mrb[10].mxu1 }
 0x273   : > { %v816_v42 = vpop.f32.mrb[11].mxu1 }
 0x278   : > { %v597_v44 = vpop.f32.mrb[12].mxu1 }
 0x279   : > { %v827_v45 = vpop.f32.mrb[13].mxu1  ;;  %v603_v48 = vsel %vm207_vm1, %v597_v44, -inf }
 0x27a   : > { %v600_v46 = vpop.f32.mrb[14].mxu1 }
 0x27b   : > { %497 = vrot.lane.b32.xlu1 %v763_v43, %s880_s22  ;;  %v828_v47 = vpop.f32.mrb[15].mxu1 }
 0x288   : > { %381 = vrot.lane.b32.xlu0 %v763_v43, %s879_s21 }
 0x29f   : > { %604 = vmax.xlane.f32.xlu1 %v603_v48 }
 0x2b0   : > { %613 = vrot.lane.b32.xlu1 %v763_v43, %s881_s23 }
 0x2f7   : > { %v370_v49 = vpop.xlane.xlu1 %369 }
 0x2f8   : > { %v371_v50 = vsub.f32 %v362_v33, %v370_v49 }
 0x2fa   : > { %v372_v51 = vmul.f32 1.442695, %v371_v50 }
 0x2fb   : > { %v498_v58 = vpop.permute.xlu1 %497 }
 0x2fc   : > { %855 = vpow2.f32 %v372_v51  ;;  %v503_v61 = vsel %vm267_vm2, %v498_v58, 0 }
 0x2ff   : > { %v489_v52 = vpop.xlane.xlu0 %488 }
 0x300   : > { %v490_v53 = vsub.f32 %v481_v38, %v489_v52 }
 0x302   : > { %v491_v54 = vmul.f32 1.442695, %v490_v53 }
 0x303   : > { %v382_v55 = vpop.permute.xlu0 %381 }
 0x304   : > { %857 = vpow2.f32 %v491_v54  ;;  %v387_v56 = vsel %vm267_vm2, %v382_v55, 0 }
 0x305   : > { %806 = vmatpush3.bf16.msra.mxu0 %v387_v56 }
 0x306   : > { %v856_v57 = vpop.eup %855  ;;  %817 = vmatprep.subr.bf16.mxu0 %v877_v0 }
 0x307   : > { %v374_v59 = vsel %vm207_vm1, %v856_v57, 0.0  ;;  %v377_v60 = vpack.c.bf16 %v856_v57, %v856_v57 }
 0x308   : > { %375 = vadd.xlane.f32.xlu0 %v374_v59 }
 0x309   : > { %808 = vmatmul.mubr.msk.bf16.vlgmr.msra.gmra.mrb[4].mxu0 %vm207_vm1, %v377_v60 }
 0x30a   : > { %818 = vmatpush3.bf16.msra.mxu0 %v503_v61  ;;  %819 = vmatprep.mubr.msk.bf16.mxu0 %vm878_vm0, %v877_v0 }
 0x30b   : > { %829 = vmatprep.subr.bf16.mxu0 %v877_v0 }
 0x30e   : > { %v858_v62 = vpop.eup %857 }
 0x30f   : > { %v493_v63 = vsel %vm207_vm1, %v858_v62, 0.0  ;;  %v496_v1 = vpack.c.bf16 %v858_v62, %v858_v62 }
 0x310   : > { %494 = vadd.xlane.f32.xlu1 %v493_v63 }
 0x311   : > { %820 = vmatmul.mubr.msk.bf16.vlgmr.msra.gmra.mrb[8].mxu0 %vm207_vm1, %v496_v1 }
 0x312   : > { %831 = vmatprep.mubr.msk.bf16.mxu0 %vm878_vm0, %v877_v0 }
 0x32c   : > { %v605_v2 = vpop.xlane.xlu1 %604 }
 0x32d   : > { %v606_v3 = vsub.f32 %v597_v44, %v605_v2 }
 0x32f   : > { %v607_v4 = vmul.f32 1.442695, %v606_v3 }
 0x330   : > { %v614_v5 = vpop.permute.xlu1 %613 }
 0x331   : > { %859 = vpow2.f32 %v607_v4  ;;  %v619_v6 = vsel %vm267_vm2, %v614_v5, 0 }
 0x332   : > { %830 = vmatpush3.bf16.msra.mxu0 %v619_v6 }
 0x33b   : > { %v860_v7 = vpop.eup %859 }
 0x33c   : > { %v609_v8 = vsel %vm207_vm1, %v860_v7, 0.0  ;;  %v612_v9 = vpack.c.bf16 %v860_v7, %v860_v7 }
 0x33d   : > { %610 = vadd.xlane.f32.xlu0 %v609_v8 }
 0x33e   : > { %832 = vmatmul.mubr.msk.bf16.vlgmr.msra.gmra.mrb[12].mxu0 %vm207_vm1, %v612_v9 }
 0x341   : > { %261 = vadd.xlane.f32.xlu0 %v260_v10 }
 0x395   : > { %v376_v0 = vpop.xlane.xlu0 %375 }
 0x39d   : > { %v495_v13 = vpop.xlane.xlu1 %494 }
 0x3ca   : > { %v611_v11 = vpop.xlane.xlu0 %610 }
 0x3ce   : > { %v262_v12 = vpop.xlane.xlu0 %261 }
 0x3cf   : > { %861 = vrcp.f32 %v262_v12 }
 0x3d0   : > { %863 = vrcp.f32 %v376_v0 }
 0x3d1   : > { %865 = vrcp.f32 %v495_v13 }
 0x3d2   : > { %867 = vrcp.f32 %v611_v11 }
 0x3d9   : > { %v862_v14 = vpop.eup %861 }
 0x3da   : > { %v312_v15 = vmul.f32 %v862_v14, %v966_v29  ;;  %v864_v16 = vpop.eup %863 }
 0x3db   : > { %v866_v22 = vpop.eup %865 }
 0x3dc   : > { %v423_v17 = vpop.f32.mrb[4].mxu0  ;;  %313 = vst.msk [vmem:[#allocation2] sm:$0xff] %vm207_vm1, %v312_v15  ;;  %v868_v28 = vpop.eup %867 }
 0x3dd   : > { %v430_v18 = vmul.f32 %v864_v16, %v423_v17  ;;  %v809_v20 = vpop.f32.mrb[5].mxu0 }
 0x3de   : > { %v426_v21 = vpop.f32.mrb[6].mxu0 }
 0x3df   : > { %432 = vrot.lane.b32.xlu1 %v430_v18, %s882_s27  ;;  %v810_v19 = vpop.f32.mrb[7].mxu0 }
 0x3e4   : > { %v539_v23 = vpop.f32.mrb[8].mxu0 }
 0x3e5   : > { %v546_v24 = vmul.f32 %v866_v22, %v539_v23  ;;  %v821_v25 = vpop.f32.mrb[9].mxu0 }
 0x3e6   : > { %v542_v26 = vpop.f32.mrb[10].mxu0 }
 0x3e7   : > { %548 = vrot.lane.b32.xlu0 %v546_v24, %s883_s28  ;;  %v822_v27 = vpop.f32.mrb[11].mxu0 }
 0x411   : > { %v655_v29 = vpop.f32.mrb[12].mxu0 }
 0x412   : > { %v662_v30 = vmul.f32 %v868_v28, %v655_v29  ;;  %v833_v31 = vpop.f32.mrb[13].mxu0 }
 0x413   : > { %v658_v32 = vpop.f32.mrb[14].mxu0 }
 0x414   : > { %664 = vrot.lane.b32.xlu1 %v662_v30, %s884_s29  ;;  %v834_v33 = vpop.f32.mrb[15].mxu0 }
 0x451   : > { %v433_v34 = vpop.permute.xlu1 %432 }
 0x452   : > { %436 = vst.msk [vmem:[#allocation2] sm:$0xff] %vm435_vm3, %v433_v34 }
 0x459   : > { %v549_v35 = vpop.permute.xlu0 %548 }
 0x45a   : > { %552 = vst.msk [vmem:[#allocation2] sm:$0xff] %vm551_vm4, %v549_v35 }
 0x486   : > { %v665_v36 = vpop.permute.xlu1 %664 }
 0x487   : > { %668 = vst.msk [vmem:[#allocation2] sm:$0xff] %vm667_vm5, %v665_v36 }
 0x48e   : > { %v669_v37 = vld [vmem:[#allocation2] sm:$0xff] }
 0x48f   : > { %v670_v38 = vpack.c.bf16 %v669_v37, %v669_v37 }
 0x491   : > { %672 = vst.msk [vmem:[%s199_s5] sm:$0xf] %vm671_vm6, %v670_v38 }
 0x492 PF: > { %s13_s12 = sadd.s32 1, %s875_s12  }
 0x493   : > { %p10_p4 = scmp.ge.s32.totalorder %s13_s12, 4  }
 0x495   :  { %12 = sbr.rel (!%p10_p4) target bundleno = 1 (0x1), region = 68 }

// kernel: _lambda_.35
= control target key start
LH: loop header
LB: loop body
LE: loop exit
PB: predicated region body
PF: predicated region fallthrough
CT: control target
= control target key end

     0   :  { %vm16_vm0 = vcmask 261120   ;;  %vm70_vm1 = vcmask 257024   ;;  %s129_s0 = inlined_call_operand.vmem [shape: f32[16,32], index: 0, kind: input, shape index: {}]   ;;  %s130_s1 = inlined_call_operand.vmem [shape: f32[1,32], index: 1, kind: input, shape index: {}]   ;;  %s131_s2 = inlined_call_operand.vmem [shape: f32[1,32], index: 2, kind: input, shape index: {}]   ;;  %s132_s3 = inlined_call_operand.vmem [shape: bf16[16,32], index: 3, kind: output, shape index: {}]  }
   0x1   :  { %v14_v0 = vld [vmem:[%s129_s0] sm:$0xff]  ;;  %v15_v1 = vld [vmem:[%s129_s0 + $0x8] sm:$0xff] }
   0x2   :  { %v17_v2 = vsel %vm16_vm0, %v14_v0, 0.0  ;;  %v20_v3 = vsel %vm16_vm0, %v15_v1, 0.0  ;;  %v77_v21 = vld [vmem:[%s130_s1] ss:$0 sm:$0xff] }
   0x3   :  { %18 = vadd.xlane.f32.xlu0 %v17_v2  ;;  %v78_v23 = vld [vmem:[%s131_s2] ss:$0 sm:$0xff] }
   0x7   :  { %21 = vadd.xlane.f32.xlu0 %v20_v3 }
  0x90   :  { %v19_v4 = vpop.xlane.xlu0 %18 }
  0x91   :  { %v24_v5 = vmul.f32 0.03125, %v19_v4 }
  0x93   :  { %v26_v6 = vsub.f32 %v14_v0, %v24_v5 }
  0x94   :  { %v22_v7 = vpop.xlane.xlu0 %21 }
  0x95   :  { %v25_v8 = vmul.f32 0.03125, %v22_v7  ;;  %v28_v9 = vmul.f32 %v26_v6, %v26_v6 }
  0x97   :  { %v27_v10 = vsub.f32 %v15_v1, %v25_v8  ;;  %v30_v11 = vsel %vm16_vm0, %v28_v9, 0.0 }
  0x98   :  { %31 = vadd.xlane.f32.xlu1 %v30_v11 }
  0x99   :  { %v29_v12 = vmul.f32 %v27_v10, %v27_v10 }
  0x9b   :  { %v33_v13 = vsel %vm16_vm0, %v29_v12, 0.0 }
  0x9c   :  { %34 = vadd.xlane.f32.xlu1 %v33_v13 }
 0x125   :  { %v32_v14 = vpop.xlane.xlu1 %31 }
 0x126   :  { %v36_v15 = vmul.f32 0.03125, %v32_v14 }
 0x128   :  { %v38_v16 = vadd.f32 1e-05, %v36_v15 }
 0x129   :  { %v35_v17 = vpop.xlane.xlu1 %34 }
 0x12a   :  { %83 = vrsqrt.f32 %v38_v16  ;;  %v37_v18 = vmul.f32 0.03125, %v35_v17 }
 0x12c   :  { %v39_v19 = vadd.f32 1e-05, %v37_v18 }
 0x12e   :  { %85 = vrsqrt.f32 %v39_v19 }
 0x134   :  { %v84_v20 = vpop.eup %83 }
 0x135   :  { %v42_v22 = vmul.f32 %v84_v20, %v26_v6 }
 0x137   :  { %v51_v24 = vmul.f32 %v77_v21, %v42_v22 }
 0x138   :  { %v86_v25 = vpop.eup %85 }
 0x139   :  { %v60_v26 = vadd.f32 %v78_v23, %v51_v24  ;;  %v43_v27 = vmul.f32 %v86_v25, %v27_v10 }
 0x13b   :  { %v81_v28 = vpack.c.bf16 %v60_v26, %v60_v26  ;;  %v52_v29 = vmul.f32 %v77_v21, %v43_v27 }
 0x13d   :  { %71 = vst.msk [vmem:[%s132_s3] sm:$0xf] %vm70_vm1, %v81_v28  ;;  %v61_v30 = vadd.f32 %v78_v23, %v52_v29 }
 0x13f   :  { %v82_v31 = vpack.c.bf16 %v61_v30, %v61_v30 }
 0x141   :  { %72 = vst.msk [vmem:[%s132_s3 + $0x4] sm:$0xf] %vm70_vm1, %v82_v31 }

// kernel: _lambda_.40
= control target key start
LH: loop header
LB: loop body
LE: loop exit
PB: predicated region body
PF: predicated region fallthrough
CT: control target
= control target key end

     0   :  { %vm19_vm0 = vcmask 523264   ;;  %v151_v0 = vmov 0.0   ;;  %vm152_vm1 = vmmov 0   ;;  %vm47_vm2 = vcmask 261120   ;;  %s195_s1 = inlined_call_operand.vmem [shape: bf16[32,64], index: 1, kind: input, shape index: {}]   ;;  %s196_s0 = inlined_call_operand.vmem [shape: bf16[16,32], index: 0, kind: input, shape index: {}]   ;;  %s197_s2 = inlined_call_operand.vmem [shape: f32[1,64], index: 2, kind: input, shape index: {}]   ;;  %s198_s3 = inlined_call_operand.vmem [shape: bf16[16,64], index: 3, kind: output, shape index: {}]  }
   0x1   :  { %138 = vmatprep.subr.bf16.mxu0 %v151_v0  ;;  %v148_v1 = vld [vmem:[%s195_s1] sm:$0xff]   ;;  %142 = vmatprep.mubr.msk.bf16.mxu0 %vm152_vm1, %v151_v0  ;;  %20 = vst.msk [vmem:[#allocation2] sm:$0xff] %vm19_vm0, %v151_v0  ;;  %21 = vst.msk [vmem:[#allocation2 + $0x8] sm:$0xff] %vm19_vm0, %v151_v0  ;;  %v149_v2 = vld [vmem:[%s195_s1 + $0x8] sm:$0xff]   ;;  %vm119_vm3 = vcmask 519168  }
   0x2   :  { %139 = vmatpush3.bf16.msra.mxu0 %v148_v1  ;;  %v150_v3 = vld [vmem:[%s196_s0] sm:$0xff]  }
   0x3   :  { %140 = vmatprep.subr.bf16.mxu0 %v151_v0  ;;  %v130_v12 = vld [vmem:[%s197_s2] ss:$0 sm:$0xff] }
   0x6   :  { %141 = vmatpush3.bf16.msra.mxu0 %v149_v2 }
   0x8   :  { %v22_v4 = vld [vmem:[#allocation2] sm:$0xff]  ;;  %v23_v6 = vld [vmem:[#allocation2 + $0x8] sm:$0xff] }
   0x9   :  { %143 = vmatmul.mubr.msk.bf16.vlgmr.msra.gmra.mrb[0].mxu0 %vm47_vm2, %v150_v3 }
  0xdc   :  { %v85_v5 = vpop.f32.mrb[0].mxu0 }
  0xdd   :  { %v92_v7 = vadd.f32 %v85_v5, %v22_v4  ;;  %v144_v8 = vpop.f32.mrb[1].mxu0 }
  0xde   :  { %v88_v9 = vpop.f32.mrb[2].mxu0 }
  0xdf   :  { %95 = vst.msk [vmem:[#allocation2] sm:$0xff] %vm19_vm0, %v92_v7  ;;  %v93_v10 = vadd.f32 %v88_v9, %v23_v6  ;;  %v145_v11 = vpop.f32.mrb[3].mxu0 }
  0xe1   :  { %96 = vst.msk [vmem:[#allocation2 + $0x8] sm:$0xff] %vm19_vm0, %v93_v10 }
  0xe6   :  { %v100_v13 = vld [vmem:[#allocation2] sm:$0xff] }
  0xe7   :  { %v109_v14 = vadd.f32 %v130_v12, %v100_v13 }
  0xe8   :  { %v101_v15 = vld [vmem:[#allocation2 + $0x8] sm:$0xff] }
  0xe9   :  { %v133_v16 = vpack.c.bf16 %v109_v14, %v109_v14  ;;  %v110_v17 = vadd.f32 %v130_v12, %v101_v15 }
  0xeb   :  { %120 = vst.msk [vmem:[%s198_s3] sm:$0xf] %vm119_vm3, %v133_v16  ;;  %v134_v18 = vpack.c.bf16 %v110_v17, %v110_v17 }
  0xed   :  { %121 = vst.msk [vmem:[%s198_s3 + $0x4] sm:$0xf] %vm119_vm3, %v134_v18 }

// kernel: _lambda_.39
= control target key start
LH: loop header
LB: loop body
LE: loop exit
PB: predicated region body
PF: predicated region fallthrough
CT: control target
= control target key end

     0   :  { %vm23_vm0 = vcmask 261120   ;;  %v181_v15 = vmov 0.0   ;;  %vm182_vm1 = vmmov 0   ;;  %vm145_vm2 = vcmask 257024   ;;  %s245_s0 = inlined_call_operand.vmem [shape: f32[16,32], index: 0, kind: input, shape index: {}]   ;;  %s246_s3 = inlined_call_operand.vmem [shape: bf16[32,32], index: 3, kind: input, shape index: {}]   ;;  %s247_s1 = inlined_call_operand.vmem [shape: f32[1,32], index: 1, kind: input, shape index: {}]   ;;  %s248_s2 = inlined_call_operand.vmem [shape: f32[1,32], index: 2, kind: input, shape index: {}]   ;;  %s249_s4 = inlined_call_operand.vmem [shape: f32[1,32], index: 4, kind: input, shape index: {}]   ;;  %s250_s5 = inlined_call_operand.vmem [shape: bf16[16,32], index: 5, kind: output, shape index: {}]  }
   0x1   :  { %v21_v0 = vld [vmem:[%s245_s0] sm:$0xff]  ;;  %v22_v1 = vld [vmem:[%s245_s0 + $0x8] sm:$0xff]  ;;  %165 = vmatprep.subr.bf16.mxu0 %v181_v15  ;;  %169 = vmatprep.mubr.msk.bf16.mxu0 %vm182_vm1, %v181_v15 }
   0x2   :  { %v24_v2 = vsel %vm23_vm0, %v21_v0, 0.0  ;;  %v27_v3 = vsel %vm23_vm0, %v22_v1, 0.0  ;;  %v175_v14 = vld [vmem:[%s246_s3] sm:$0xff]   ;;  %v176_v16 = vld [vmem:[%s246_s3 + $0x8] sm:$0xff]  }
   0x3   :  { %25 = vadd.xlane.f32.xlu0 %v24_v2  ;;  %166 = vmatpush3.bf16.msra.mxu0 %v175_v14  ;;  %v152_v25 = vld [vmem:[%s247_s1] ss:$0 sm:$0xff] }
   0x4   :  { %167 = vmatprep.subr.bf16.mxu0 %v181_v15  ;;  %v153_v29 = vld [vmem:[%s248_s2] ss:$0 sm:$0xff] }
   0x5   :  { %v154_v34 = vld [vmem:[%s249_s4] ss:$0 sm:$0xff] }
   0x7   :  { %28 = vadd.xlane.f32.xlu0 %v27_v3  ;;  %168 = vmatpush3.bf16.msra.mxu0 %v176_v16 }
  0x90   :  { %v26_v4 = vpop.xlane.xlu0 %25 }
  0x91   :  { %v31_v5 = vmul.f32 0.03125, %v26_v4 }
  0x93   :  { %v33_v6 = vsub.f32 %v21_v0, %v31_v5 }
  0x94   :  { %v29_v7 = vpop.xlane.xlu0 %28 }
  0x95   :  { %v32_v8 = vmul.f32 0.03125, %v29_v7  ;;  %v35_v9 = vmul.f32 %v33_v6, %v33_v6 }
  0x97   :  { %v34_v10 = vsub.f32 %v22_v1, %v32_v8  ;;  %v37_v11 = vsel %vm23_vm0, %v35_v9, 0.0 }
  0x98   :  { %38 = vadd.xlane.f32.xlu1 %v37_v11 }
  0x99   :  { %v36_v12 = vmul.f32 %v34_v10, %v34_v10 }
  0x9b   :  { %v40_v13 = vsel %vm23_vm0, %v36_v12, 0.0 }
  0x9c   :  { %41 = vadd.xlane.f32.xlu1 %v40_v13 }
 0x125   :  { %v39_v17 = vpop.xlane.xlu1 %38 }
 0x126   :  { %v43_v18 = vmul.f32 0.03125, %v39_v17 }
 0x128   :  { %v45_v19 = vadd.f32 1e-05, %v43_v18 }
 0x129   :  { %v42_v20 = vpop.xlane.xlu1 %41 }
 0x12a   :  { %177 = vrsqrt.f32 %v45_v19  ;;  %v44_v21 = vmul.f32 0.03125, %v42_v20 }
 0x12c   :  { %v46_v22 = vadd.f32 1e-05, %v44_v21 }
 0x12e   :  { %179 = vrsqrt.f32 %v46_v22 }
 0x134   :  { %v178_v23 = vpop.eup %177 }
 0x135   :  { %v49_v24 = vmul.f32 %v178_v23, %v33_v6 }
 0x137   :  { %v58_v28 = vmul.f32 %v152_v25, %v49_v24 }
 0x138   :  { %v180_v26 = vpop.eup %179 }
 0x139   :  { %v50_v27 = vmul.f32 %v180_v26, %v34_v10  ;;  %v67_v31 = vadd.f32 %v153_v29, %v58_v28 }
 0x13b   :  { %v59_v30 = vmul.f32 %v152_v25, %v50_v27 }
 0x13d   :  { %v68_v32 = vadd.f32 %v153_v29, %v59_v30 }
 0x13f   :  { %v69_v33 = vpack.c.bf16 %v68_v32, %v67_v31 }
 0x141   :  { %170 = vmatmul.mubr.msk.bf16.vlgmr.msra.gmra.mrb[0].mxu0 %vm23_vm0, %v69_v33 }
 0x214   :  { %v130_v35 = vpop.f32.mrb[0].mxu0 }
 0x215   :  { %v131_v36 = vadd.f32 %v154_v34, %v130_v35  ;;  %v171_v37 = vpop.f32.mrb[1].mxu0 }
 0x216   :  { %v133_v38 = vpop.f32.mrb[2].mxu0 }
 0x217   :  { %v160_v39 = vpack.c.bf16 %v131_v36, %v131_v36  ;;  %v134_v40 = vadd.f32 %v154_v34, %v133_v38  ;;  %v172_v41 = vpop.f32.mrb[3].mxu0 }
 0x219   :  { %146 = vst.msk [vmem:[%s250_s5] sm:$0xf] %vm145_vm2, %v160_v39  ;;  %v161_v42 = vpack.c.bf16 %v134_v40, %v134_v40 }
 0x21b   :  { %147 = vst.msk [vmem:[%s250_s5 + $0x4] sm:$0xf] %vm145_vm2, %v161_v42 }

// kernel: _lambda_.37
= control target key start
LH: loop header
LB: loop body
LE: loop exit
PB: predicated region body
PF: predicated region fallthrough
CT: control target
= control target key end

     0   :  { %s911_s12 = smov 0   ;;  %s1013_s0 = inlined_call_operand.vmem [shape: bf16[2,8,32], index: 0, kind: input, shape index: {}]   ;;  %s1014_s1 = inlined_call_operand.vmem [shape: bf16[2,8,32], index: 1, kind: input, shape index: {}]   ;;  %s1015_s2 = inlined_call_operand.vmem [shape: bf16[2,8,32], index: 2, kind: input, shape index: {}]   ;;  %s1016_s3 = inlined_call_operand.vmem [shape: bf16[2,8,32], index: 3, kind: output, shape index: {}]  }
   0x1 LB: > { %s756_s13 = sadd.s32 4294967295, %s881_s12   ;;  %p760_p0 = scmp.ge.s32.totalorder %s881_s12, 1  ;;  %s881_s12 = sphi %s911_s12, %s13_s12  }
   0x2   : > { %p154_p1 = scmp.lt.s32.totalorder %s881_s12, 3 }
   0x4   : > { %p155_p2 = pnand %p760_p0, %p154_p1 }
   0x5   : > { %p184_p3 = scmp.lt.s32.totalorder (!%p155_p2), %s756_s13, 1  ;;  %v883_v0 = vmov (!%p155_p2), 0.0   ;;  %vm884_vm0 = vmmov (!%p155_p2), 0   ;;  %vm213_vm1 = vcmask (!%p155_p2), 64512   ;;  %s885_s21 = smov (!%p155_p2), 120   ;;  %v207_v8 = vlaneseq (!%p155_p2) }
   0x6   : > { %158 = sbr.rel (%p155_p2) target bundleno = 1174 (0x496), region = 32  ;;  %793 = vmatprep.subr.bf16.mxu0 (!%p155_p2), %v883_v0  ;;  %795 = vmatprep.mubr.msk.bf16.mxu0 (!%p155_p2), %vm884_vm0, %v883_v0  ;;  %s886_s22 = smov (!%p155_p2), 112   ;;  %vm273_vm3 = vcmask (!%p155_p2), 1043456   ;;  %vm441_vm4 = vcmask (!%p155_p2), 130112   ;;  %vm557_vm5 = vcmask (!%p155_p2), 195712   ;;  %vm673_vm6 = vcmask (!%p155_p2), 261312  }
   0x7   : > { %799 = vmatprep.subr.bf16.mxu1 (!%p155_p2), %v883_v0  ;;  %801 = vmatprep.mubr.msk.bf16.mxu1 (!%p155_p2), %vm884_vm0, %v883_v0  ;;  %s887_s23 = smov (!%p155_p2), 104   ;;  %v208_v9 = vshrl.u32 (!%p155_p2), %v207_v8, 7  ;;  %v210_v10 = vand.u32 (!%p155_p2), 127, %v207_v8  ;;  %s888_s27 = smov (!%p155_p2), 8   ;;  %vm677_vm7 = vcmask (!%p155_p2), 257024  }
   0x8   : > { %s889_s28 = smov (!%p155_p2), 16   ;;  %s890_s29 = smov (!%p155_p2), 24  }
   0x9   : > { %vm211_vm2 = vcmp.gt.s32.totalorder (!%p155_p2), %v210_v10, %v208_v9 }
   0xa   : > { %v946_v11 = vsel (!%p155_p2), %vm211_vm2, -1e+30, %v883_v0 }
   0xd   : > { %s1018_s13 = smov (!%p184_p3, %s756_s13), 1 }
   0xe   : > { %s925_s14 = sshll.u32 %s1018_s13, 2 }
   0xf   : > { %s191_s17 = scalar_lea.vmem %s1014_s1, %s925_s14  ;;  %s187_s20 = scalar_lea.vmem %s1013_s0, %s925_s14 }
  0x10   : > { %v202_v1 = vld [vmem:[%s191_s17] sm:$0xf]  ;;  %s195_s26 = scalar_lea.vmem %s1015_s2, %s925_s14  ;;  %s199_s5 = scalar_lea.vmem %s1016_s3, %s925_s14 }
  0x11   : > { %v218_v2 = vsel %vm213_vm1, %v202_v1, 0  ;;  %v201_v3 = vld [vmem:[%s187_s20] sm:$0xf]  ;;  %v767_v7 = vcombine.low %v202_v1, %v202_v1 }
  0x12   : > { %794 = vmatpush3.bf16.xpose.msra.mxu0 %v218_v2  ;;  %v204_v4 = vunpack.c.l.bf16 %v201_v3  ;;  %v203_v18 = vld [vmem:[%s195_s26] sm:$0xf] }
  0x13   : > { %811 = vmatprep.subr.bf16.mxu0 %v883_v0  ;;  %v275_v19 = vsel %vm273_vm3, %v203_v18, 0  ;;  %v769_v51 = vcombine.low %v203_v18, %v203_v18 }
  0x14   : > { %v205_v5 = vmul.f32 0.35355338, %v204_v4  ;;  %800 = vmatpush3.bf16.msra.mxu1 %v275_v19 }
  0x15   : > { %805 = vmatprep.subr.bf16.mxu1 %v883_v0 }
  0x16   : > { %v206_v6 = vpack.c.bf16 %v205_v5, %v205_v5 }
  0x18   : > { %321 = vrot.lane.b32.xlu1 %v206_v6, %s885_s21 }
  0x19   : > { %796 = vmatmul.mubr.msk.bf16.vlgmr.msra.gmra.mrb[0].mxu0 %vm213_vm1, %v206_v6 }
  0x1a   : > { %813 = vmatprep.mubr.msk.bf16.mxu0 %vm884_vm0, %v883_v0 }
  0x1c   : > { %445 = vrot.lane.b32.xlu1 %v767_v7, %s886_s22 }
  0x20   : > { %443 = vrot.lane.b32.xlu1 %v206_v6, %s886_s22 }
  0x24   : > { %561 = vrot.lane.b32.xlu1 %v767_v7, %s887_s23 }
  0x28   : > { %559 = vrot.lane.b32.xlu1 %v206_v6, %s887_s23 }
  0x8a   : > { %v322_v25 = vpop.permute.xlu1 %321 }
  0x8e   : > { %v446_v28 = vpop.permute.xlu1 %445 }
  0x8f   : > { %v451_v29 = vsel %vm213_vm1, %v446_v28, 0 }
  0x92   : > { %v444_v30 = vpop.permute.xlu1 %443 }
  0x96   : > { %v562_v31 = vpop.permute.xlu1 %561 }
  0x97   : > { %v567_v32 = vsel %vm213_vm1, %v562_v31, 0 }
  0x9a   : > { %v560_v33 = vpop.permute.xlu1 %559 }
  0xec   : > { %v254_v12 = vpop.f32.mrb[0].mxu0 }
  0xed   : > { %v255_v13 = vadd.f32 %v254_v12, %v946_v11  ;;  %v797_v14 = vpop.f32.mrb[1].mxu0 }
  0xee   : > { %v257_v15 = vpop.f32.mrb[2].mxu0 }
  0xef   : > { %v798_v16 = vpop.f32.mrb[3].mxu0  ;;  %v260_v17 = vsel %vm213_vm1, %v255_v13, -inf }
  0xf0   : > { %261 = vmax.xlane.f32.xlu0 %v260_v17 }
 0x106   : > { %326 = vrot.lane.b32.xlu0 %v767_v7, %s885_s21 }
 0x17d   : > { %v262_v20 = vpop.xlane.xlu0 %261 }
 0x17e   : > { %v263_v21 = vsub.f32 %v255_v13, %v262_v20 }
 0x180   : > { %v264_v22 = vmul.f32 1.442695, %v263_v21 }
 0x181   : > { %v327_v23 = vpop.permute.xlu0 %326 }
 0x182   : > { %859 = vpow2.f32 %v264_v22  ;;  %v332_v26 = vsel %vm213_vm1, %v327_v23, 0 }
 0x18c   : > { %v957_v24 = vpop.eup %859 }
 0x18d   : > { %v269_v27 = vpack.c.bf16 %v957_v24, %v957_v24  ;;  %v266_v18 = vsel %vm213_vm1, %v957_v24, 0.0 }
 0x18f   : > { %802 = vmatmul.mubr.msk.bf16.vlgmr.msra.gmra.mrb[0].mxu1 %vm213_vm1, %v269_v27 }
 0x190   : > { %806 = vmatpush3.bf16.xpose.msra.mxu1 %v332_v26  ;;  %807 = vmatprep.mubr.msk.bf16.mxu1 %vm884_vm0, %v883_v0 }
 0x191   : > { %817 = vmatprep.subr.bf16.mxu1 %v883_v0 }
 0x197   : > { %808 = vmatmul.mubr.msk.bf16.vlgmr.msra.gmra.mrb[4].mxu1 %vm213_vm1, %v322_v25 }
 0x198   : > { %818 = vmatpush3.bf16.xpose.msra.mxu1 %v451_v29  ;;  %819 = vmatprep.mubr.msk.bf16.mxu1 %vm884_vm0, %v883_v0 }
 0x199   : > { %829 = vmatprep.subr.bf16.mxu1 %v883_v0 }
 0x19f   : > { %820 = vmatmul.mubr.msk.bf16.vlgmr.msra.gmra.mrb[8].mxu1 %vm213_vm1, %v444_v30 }
 0x1a0   : > { %830 = vmatpush3.bf16.xpose.msra.mxu1 %v567_v32  ;;  %831 = vmatprep.mubr.msk.bf16.mxu1 %vm884_vm0, %v883_v0 }
 0x1a7   : > { %832 = vmatmul.mubr.msk.bf16.vlgmr.msra.gmra.mrb[12].mxu1 %vm213_vm1, %v560_v33 }
 0x262   : > { %v976_v34 = vpop.f32.mrb[0].mxu1 }
 0x263   : > { %v803_v35 = vpop.f32.mrb[1].mxu1 }
 0x264   : > { %v314_v36 = vpop.f32.mrb[2].mxu1 }
 0x265   : > { %v804_v37 = vpop.f32.mrb[3].mxu1 }
 0x26a   : > { %v368_v38 = vpop.f32.mrb[4].mxu1 }
 0x26b   : > { %v369_v39 = vadd.f32 %v368_v38, %v946_v11  ;;  %v809_v40 = vpop.f32.mrb[5].mxu1 }
 0x26c   : > { %v371_v41 = vpop.f32.mrb[6].mxu1 }
 0x26d   : > { %v810_v42 = vpop.f32.mrb[7].mxu1  ;;  %v374_v43 = vsel %vm213_vm1, %v369_v39, -inf }
 0x26e   : > { %375 = vmax.xlane.f32.xlu1 %v374_v43 }
 0x272   : > { %v487_v44 = vpop.f32.mrb[8].mxu1 }
 0x273   : > { %v488_v45 = vadd.f32 %v487_v44, %v946_v11  ;;  %v821_v46 = vpop.f32.mrb[9].mxu1 }
 0x274   : > { %v490_v47 = vpop.f32.mrb[10].mxu1 }
 0x275   : > { %v493_v48 = vsel %vm213_vm1, %v488_v45, -inf  ;;  %v822_v49 = vpop.f32.mrb[11].mxu1 }
 0x276   : > { %494 = vmax.xlane.f32.xlu0 %v493_v48 }
 0x27a   : > { %v603_v50 = vpop.f32.mrb[12].mxu1 }
 0x27b   : > { %v833_v52 = vpop.f32.mrb[13].mxu1  ;;  %v604_v55 = vadd.f32 %v603_v50, %v946_v11 }
 0x27c   : > { %v606_v53 = vpop.f32.mrb[14].mxu1 }
 0x27d   : > { %v834_v54 = vpop.f32.mrb[15].mxu1  ;;  %v609_v56 = vsel %vm213_vm1, %v604_v55, -inf }
 0x27f   : > { %503 = vrot.lane.b32.xlu1 %v769_v51, %s886_s22 }
 0x28c   : > { %387 = vrot.lane.b32.xlu0 %v769_v51, %s885_s21 }
 0x2a3   : > { %610 = vmax.xlane.f32.xlu1 %v609_v56 }
 0x2b4   : > { %619 = vrot.lane.b32.xlu1 %v769_v51, %s887_s23 }
 0x2fb   : > { %v376_v57 = vpop.xlane.xlu1 %375 }
 0x2fc   : > { %v377_v58 = vsub.f32 %v369_v39, %v376_v57 }
 0x2fe   : > { %v378_v59 = vmul.f32 1.442695, %v377_v58 }
 0x2ff   : > { %v504_v3 = vpop.permute.xlu1 %503 }
 0x300   : > { %861 = vpow2.f32 %v378_v59  ;;  %v509_v6 = vsel %vm273_vm3, %v504_v3, 0 }
 0x303   : > { %v495_v60 = vpop.xlane.xlu0 %494 }
 0x304   : > { %v496_v61 = vsub.f32 %v488_v45, %v495_v60 }
 0x306   : > { %v497_v62 = vmul.f32 1.442695, %v496_v61 }
 0x307   : > { %v388_v63 = vpop.permute.xlu0 %387 }
 0x308   : > { %863 = vpow2.f32 %v497_v62  ;;  %v393_v1 = vsel %vm273_vm3, %v388_v63, 0 }
 0x309   : > { %812 = vmatpush3.bf16.msra.mxu0 %v393_v1 }
 0x30a   : > { %v862_v2 = vpop.eup %861  ;;  %823 = vmatprep.subr.bf16.mxu0 %v883_v0 }
 0x30b   : > { %v380_v4 = vsel %vm213_vm1, %v862_v2, 0.0  ;;  %v383_v5 = vpack.c.bf16 %v862_v2, %v862_v2 }
 0x30c   : > { %381 = vadd.xlane.f32.xlu0 %v380_v4 }
 0x30d   : > { %814 = vmatmul.mubr.msk.bf16.vlgmr.msra.gmra.mrb[4].mxu0 %vm213_vm1, %v383_v5 }
 0x30e   : > { %824 = vmatpush3.bf16.msra.mxu0 %v509_v6  ;;  %825 = vmatprep.mubr.msk.bf16.mxu0 %vm884_vm0, %v883_v0 }
 0x30f   : > { %835 = vmatprep.subr.bf16.mxu0 %v883_v0 }
 0x312   : > { %v864_v7 = vpop.eup %863 }
 0x313   : > { %v499_v8 = vsel %vm213_vm1, %v864_v7, 0.0  ;;  %v502_v9 = vpack.c.bf16 %v864_v7, %v864_v7 }
 0x314   : > { %500 = vadd.xlane.f32.xlu1 %v499_v8 }
 0x315   : > { %826 = vmatmul.mubr.msk.bf16.vlgmr.msra.gmra.mrb[8].mxu0 %vm213_vm1, %v502_v9 }
 0x316   : > { %837 = vmatprep.mubr.msk.bf16.mxu0 %vm884_vm0, %v883_v0 }
 0x330   : > { %v611_v10 = vpop.xlane.xlu1 %610 }
 0x331   : > { %v612_v11 = vsub.f32 %v604_v55, %v611_v10 }
 0x333   : > { %v613_v12 = vmul.f32 1.442695, %v612_v11 }
 0x334   : > { %v620_v13 = vpop.permute.xlu1 %619 }
 0x335   : > { %865 = vpow2.f32 %v613_v12  ;;  %v625_v14 = vsel %vm273_vm3, %v620_v13, 0 }
 0x336   : > { %836 = vmatpush3.bf16.msra.mxu0 %v625_v14 }
 0x33f   : > { %v866_v15 = vpop.eup %865 }
 0x340   : > { %v615_v16 = vsel %vm213_vm1, %v866_v15, 0.0  ;;  %v618_v17 = vpack.c.bf16 %v866_v15, %v866_v15 }
 0x341   : > { %616 = vadd.xlane.f32.xlu0 %v615_v16 }
 0x342   : > { %838 = vmatmul.mubr.msk.bf16.vlgmr.msra.gmra.mrb[12].mxu0 %vm213_vm1, %v618_v17 }
 0x345   : > { %267 = vadd.xlane.f32.xlu0 %v266_v18 }
 0x399   : > { %v382_v0 = vpop.xlane.xlu0 %381 }
 0x3a1   : > { %v501_v21 = vpop.xlane.xlu1 %500 }
 0x3ce   : > { %v617_v19 = vpop.xlane.xlu0 %616 }
 0x3d2   : > { %v268_v20 = vpop.xlane.xlu0 %267 }
 0x3d3   : > { %867 = vrcp.f32 %v268_v20 }
 0x3d4   : > { %869 = vrcp.f32 %v382_v0 }
 0x3d5   : > { %871 = vrcp.f32 %v501_v21 }
 0x3d6   : > { %873 = vrcp.f32 %v617_v19 }
 0x3dd   : > { %v868_v22 = vpop.eup %867 }
 0x3de   : > { %v318_v23 = vmul.f32 %v868_v22, %v976_v34  ;;  %v870_v25 = vpop.eup %869 }
 0x3df   : > { %v872_v30 = vpop.eup %871 }
 0x3e0   : > { %v429_v26 = vpop.f32.mrb[4].mxu0  ;;  %319 = vst.msk [vmem:[#allocation2] sm:$0xff] %vm213_vm1, %v318_v23  ;;  %v874_v34 = vpop.eup %873 }
 0x3e1   : > { %v436_v27 = vmul.f32 %v870_v25, %v429_v26  ;;  %v815_v28 = vpop.f32.mrb[5].mxu0 }
 0x3e2   : > { %v432_v29 = vpop.f32.mrb[6].mxu0 }
 0x3e3   : > { %438 = vrot.lane.b32.xlu1 %v436_v27, %s888_s27  ;;  %v816_v24 = vpop.f32.mrb[7].mxu0 }
 0x3e8   : > { %v545_v31 = vpop.f32.mrb[8].mxu0 }
 0x3e9   : > { %v552_v32 = vmul.f32 %v872_v30, %v545_v31  ;;  %v827_v33 = vpop.f32.mrb[9].mxu0 }
 0x3ea   : > { %v548_v35 = vpop.f32.mrb[10].mxu0 }
 0x3eb   : > { %554 = vrot.lane.b32.xlu0 %v552_v32, %s889_s28  ;;  %v828_v36 = vpop.f32.mrb[11].mxu0 }
 0x415   : > { %v661_v37 = vpop.f32.mrb[12].mxu0 }
 0x416   : > { %v668_v38 = vmul.f32 %v874_v34, %v661_v37  ;;  %v839_v39 = vpop.f32.mrb[13].mxu0 }
 0x417   : > { %v664_v40 = vpop.f32.mrb[14].mxu0 }
 0x418   : > { %670 = vrot.lane.b32.xlu1 %v668_v38, %s890_s29  ;;  %v840_v41 = vpop.f32.mrb[15].mxu0 }
 0x455   : > { %v439_v42 = vpop.permute.xlu1 %438 }
 0x456   : > { %442 = vst.msk [vmem:[#allocation2] sm:$0xff] %vm441_vm4, %v439_v42 }
 0x45d   : > { %v555_v43 = vpop.permute.xlu0 %554 }
 0x45e   : > { %558 = vst.msk [vmem:[#allocation2] sm:$0xff] %vm557_vm5, %v555_v43 }
 0x48a   : > { %v671_v44 = vpop.permute.xlu1 %670 }
 0x48b   : > { %674 = vst.msk [vmem:[#allocation2] sm:$0xff] %vm673_vm6, %v671_v44 }
 0x492   : > { %v675_v45 = vld [vmem:[#allocation2] sm:$0xff] }
 0x493   : > { %v676_v46 = vpack.c.bf16 %v675_v45, %v675_v45 }
 0x495   : > { %678 = vst.msk [vmem:[%s199_s5] sm:$0xf] %vm677_vm7, %v676_v46 }
 0x496 PF: > { %s13_s12 = sadd.s32 1, %s881_s12  }
 0x497   : > { %p10_p4 = scmp.ge.s32.totalorder %s13_s12, 4  }
 0x499   :  { %12 = sbr.rel (!%p10_p4) target bundleno = 1 (0x1), region = 68 }

// kernel: _lambda_.53
= control target key start
LH: loop header
LB: loop body
LE: loop exit
PB: predicated region body
PF: predicated region fallthrough
CT: control target
= control target key end

     0   :  { %v136_v0 = vmov 0.0   ;;  %vm137_vm0 = vmmov 0   ;;  %vm46_vm1 = vcmask 261120   ;;  %s176_s1 = inlined_call_operand.vmem [shape: bf16[32,128], index: 1, kind: input, shape index: {}]   ;;  %s177_s0 = inlined_call_operand.vmem [shape: bf16[16,32], index: 0, kind: input, shape index: {}]   ;;  %s178_s2 = inlined_call_operand.vmem [shape: f32[1,128], index: 2, kind: input, shape index: {}]   ;;  %s179_s3 = inlined_call_operand.vmem [shape: f32[16,128], index: 3, kind: output, shape index: {}]  }
   0x1   :  { %123 = vmatprep.subr.bf16.mxu0 %v136_v0  ;;  %v133_v1 = vld [vmem:[%s176_s1] sm:$0xff]   ;;  %127 = vmatprep.mubr.msk.bf16.mxu0 %vm137_vm0, %v136_v0  ;;  %v134_v2 = vld [vmem:[%s176_s1 + $0x8] sm:$0xff]  }
   0x2   :  { %124 = vmatpush3.bf16.msra.mxu0 %v133_v1  ;;  %v135_v3 = vld [vmem:[%s177_s0] sm:$0xff]  }
   0x3   :  { %125 = vmatprep.subr.bf16.mxu0 %v136_v0  ;;  %v119_v4 = vld [vmem:[%s178_s2] ss:$0 sm:$0xff] }
   0x6   :  { %126 = vmatpush3.bf16.msra.mxu0 %v134_v2 }
   0x9   :  { %128 = vmatmul.mubr.msk.bf16.vlgmr.msra.gmra.mrb[0].mxu0 %vm46_vm1, %v135_v3 }
  0xdc   :  { %v84_v5 = vpop.f32.mrb[0].mxu0 }
  0xdd   :  { %v107_v6 = vadd.f32 %v119_v4, %v84_v5  ;;  %v129_v7 = vpop.f32.mrb[1].mxu0 }
  0xde   :  { %v87_v8 = vpop.f32.mrb[2].mxu0 }
  0xdf   :  { %109 = vst [vmem:[%s179_s3] sm:$0xff] %v107_v6  ;;  %v108_v9 = vadd.f32 %v119_v4, %v87_v8  ;;  %v130_v10 = vpop.f32.mrb[3].mxu0 }
  0xe1   :  { %110 = vst [vmem:[%s179_s3 + $0x8] sm:$0xff] %v108_v9 }

</bundles_post_ra>
